<compile_context>
chip_gen: v6e
topology: v6e:2x2x1
jax: 0.10.0
libtpu: 0.0.40
codegen_flags: <defaults>
</compile_context>

<pallas_src>
import functools
import math

import jax
import jax.numpy as jnp
from jax import lax
from jax.experimental import pallas as pl
from jax.experimental.pallas import tpu as pltpu


def _pow_const(x, p):
    """x ** p for a static python exponent (matches torch.pow for these uses)."""
    p = float(p)
    if p == 1.0:
        return x
    if p.is_integer() and p > 0:
        n = int(p)
        result = None
        base = x
        while n:
            if n & 1:
                result = base if result is None else result * base
            base = base * base
            n >>= 1
        return result
    return jnp.exp(p * jnp.log(x))


def _tal_kernel(ps_ref, pb_t_ref, anc_t_ref, pd_atan_ref,
                gl_ref, gl_row_ref, gb_ref, gb_t_ref, gt_atan_ref, mg_ref,
                tb_t_ref, ts_t_ref, fg_ref, tgi_ref,
                *, topk, num_classes, alpha, beta, eps, iou_eps,
                n_max_boxes, n_anchors):
    N, A, nc = n_max_boxes, n_anchors, num_classes

    ps = ps_ref[0]              # (nc, A)  predicted class scores (class-major)
    pb = pb_t_ref[0]            # (4, A)   predicted boxes x1,y1,x2,y2 (coord-major)
    ap = anc_t_ref[...]         # (2, A)   anchor centers x,y
    pd_atan = pd_atan_ref[0]    # (1, A)   atan(w/h) of predicted boxes (precomputed glue)
    gl = gl_ref[0]              # (N, 1)   gt labels (int32)
    gl_row = gl_row_ref[0]      # (1, N)   gt labels, row layout (int32)
    gb = gb_ref[0]              # (N, 4)   gt boxes x1,y1,x2,y2
    gb_t = gb_t_ref[0]          # (8, N)   gt boxes coord-major, zero padded to 8 rows
    gt_atan = gt_atan_ref[0]    # (N, 1)   atan(w/h) of gt boxes (precomputed glue)
    mg = mg_ref[0]              # (N, 1)   gt validity mask (0/1 float)

    # ---------------- get_box_metrics ----------------
    # bbox_scores[n, a] = pd_scores[a, gt_labels[n]] -> one-hot(labels) @ class-major scores.
    # Pure NN contraction on the MXU (no transposed operands).
    lbl_iota = lax.broadcasted_iota(jnp.int32, (N, nc), 1)
    onehot_lbl = (gl == lbl_iota).astype(jnp.float32)                       # (N, nc)
    bbox_scores = lax.dot_general(
        onehot_lbl, ps, dimension_numbers=(((1,), (0,)), ((), ())),
        preferred_element_type=jnp.float32)                                 # (N, A)

    # CIoU(gt[n], pred[a]) broadcast over (N, A)  (bbox_iou, xywh=False, CIoU=True).
    # Exact f32 divides for reference parity (overlaps**beta amplifies recip error).
    b1x1, b1y1, b1x2, b1y2 = gb[:, 0:1], gb[:, 1:2], gb[:, 2:3], gb[:, 3:4]
    b2x1, b2y1, b2x2, b2y2 = pb[0:1, :], pb[1:2, :], pb[2:3, :], pb[3:4, :]
    w1, h1 = b1x2 - b1x1, b1y2 - b1y1 + iou_eps
    w2, h2 = b2x2 - b2x1, b2y2 - b2y1 + iou_eps
    inter = (jnp.maximum(jnp.minimum(b1x2, b2x2) - jnp.maximum(b1x1, b2x1), 0.0) *
             jnp.maximum(jnp.minimum(b1y2, b2y2) - jnp.maximum(b1y1, b2y1), 0.0))
    union = w1 * h1 + w2 * h2 - inter + iou_eps
    iou = inter / union
    cw = jnp.maximum(b1x2, b2x2) - jnp.minimum(b1x1, b2x1)
    ch = jnp.maximum(b1y2, b2y2) - jnp.minimum(b1y1, b2y1)
    c2 = cw * cw + ch * ch + iou_eps
    dx = b2x1 + b2x2 - b1x1 - b1x2
    dy = b2y1 + b2y2 - b1y1 - b1y2
    rho2 = (dx * dx + dy * dy) * 0.25
    dat = pd_atan - gt_atan
    v = (4.0 / (math.pi ** 2)) * dat * dat
    alpha_ciou = v / (v - iou + (1.0 + iou_eps))
    overlaps = jnp.maximum(iou - (rho2 / c2 + v * alpha_ciou), 0.0)          # (N, A)

    align_metric = _pow_const(bbox_scores, alpha) * _pow_const(overlaps, beta)

    # ---------------- select_candidates_in_gts ----------------
    ax, ay = ap[0:1, :], ap[1:2, :]
    delta_min = jnp.minimum(jnp.minimum(ax - b1x1, ay - b1y1),
                            jnp.minimum(b1x2 - ax, b1y2 - ay))
    mask_in_gts = (delta_min > 1e-9).astype(jnp.float32)                     # (N, A)

    # ---------------- select_topk_candidates ----------------
    # torch.topk equivalent: topk iterations of "pick the current max (lowest index on
    # ties), then mask it out".  jnp.argmax (variadic reduce) has no Mosaic lowering, so
    # the max + lowest-index-among-maxima pair below is the supported equivalent with the
    # same tie-breaking.  The reference's topk_mask / count>1 handling for invalid gt rows
    # is dead work here: mask_pos is multiplied by mask_gt right after, and each iteration
    # masks its pick with -inf so no column can be counted twice (A >> topk) -> count is
    # already in {0, 1}.
    metrics = align_metric * mask_in_gts
    col_idx = lax.broadcasted_iota(jnp.int32, (N, A), 1)
    row_idx = lax.broadcasted_iota(jnp.int32, (N, A), 0)
    count = jnp.zeros((N, A), jnp.float32)
    work = metrics
    for _ in range(topk):
        m = jnp.max(work, axis=-1, keepdims=True)                            # XLU reduce
        idx = jnp.min(jnp.where(work == m, col_idx, A), axis=-1, keepdims=True)
        eq = col_idx == idx                                                  # reused twice
        count = count + eq.astype(jnp.float32)
        work = jnp.where(eq, -jnp.inf, work)
    mask_topk = count

    mask_pos = mask_topk * mask_in_gts * mg                                  # (N, A)

    # ---------------- select_highest_overlaps ----------------
    # NOTE: this module's select_highest_overlaps multiplies target_gt_idx by max_mask
    # unconditionally and returns the ORIGINAL mask_pos / fg (it is not the standard
    # ultralytics variant); the kernel follows the spec as written.
    max_mask = (overlaps == jnp.max(overlaps, axis=0, keepdims=True)).astype(jnp.float32)
    pos_sel = mask_pos * max_mask                                            # (N, A) in {0,1}
    tgi = row_idx * pos_sel.astype(jnp.int32)        # (arange * mask_pos).long() * max_mask
    fg = jnp.sum(mask_pos, axis=0, keepdims=True)                            # (1, A)
    box_idx = jnp.max(tgi, axis=0, keepdims=True)    # == unique_bbox_idx (argmax == max here)

    # ---------------- get_targets ----------------
    # target bboxes: gt_bboxes[box_idx[a], :] as one NN matmul + one (4, A) store.
    onehot_box = (row_idx == box_idx).astype(jnp.float32)                    # (N, A)
    tb8 = lax.dot_general(
        gb_t, onehot_box, dimension_numbers=(((1,), (0,)), ((), ())),
        preferred_element_type=jnp.float32)                                  # (8, A)
    tb_t_ref[0] = tb8[0:4, :]

    # _get_hard_targets: hs0[c, a] = #{n : gl[tgi[n, a]] == c}.
    # tgi[n, a] is either n (when pos_sel[n, a] == 1, n >= 1) or 0, so the per-gt histogram
    # cnt[m, a] = #{n : tgi[n, a] == m} collapses to pos_sel with row 0 replaced by
    # N - sum_n pos_sel + pos_sel[0]: one sublane reduce + one select instead of a per-m
    # compare / reduce / select loop.
    S = jnp.sum(pos_sel, axis=0, keepdims=True)                              # (1, A)
    cnt = jnp.where(row_idx == 0, float(N) - S + pos_sel, pos_sel)           # (N, A)
    cls_iota = lax.broadcasted_iota(jnp.int32, (nc, N), 0)
    onehot_lbl_t = (gl_row == cls_iota).astype(jnp.float32)                  # (nc, N)
    hs0 = lax.dot_general(
        onehot_lbl_t, cnt, dimension_numbers=(((1,), (0,)), ((), ())),
        preferred_element_type=jnp.float32)                                  # (nc, A)

    col_sum = jnp.sum(hs0, axis=1, keepdims=True)                            # (nc, 1)
    c_iota = lax.broadcasted_iota(jnp.int32, (nc, 1), 0)
    fg_col = jnp.min(jnp.where(col_sum == jnp.max(col_sum, axis=0, keepdims=True),
                               c_iota, nc), axis=0, keepdims=True)           # (1, 1)
    mask_col = (c_iota == fg_col).astype(jnp.float32)                        # (nc, 1)

    non_fg_count = jnp.sum(hs0 * (1.0 - mask_col), axis=0, keepdims=True)    # (1, A)
    # every target label is a valid class in [0, nc), so each hs0 column sums to N exactly:
    hs_fg_row = float(N) - non_fg_count                 # == hs0[fg_col, :]     (1, A)
    diff = float(N) - fg                                                     # (1, A)
    row_val = hs_fg_row - diff                                               # (1, A)
    denom_row = fg - non_fg_count                                            # (1, A)
    nz = denom_row != 0.0
    q = row_val / jnp.where(nz, denom_row, 1.0)         # exact divide, only (1, A)
    q = jnp.where(q >= 0.0, jnp.floor(q), -jnp.floor(-q))   # trunc, i.e. .long()
    new_fg_row = jnp.where(nz, q, row_val)
    hs = jnp.where(mask_col > 0.0, new_fg_row, hs0)                          # (nc, A)
    hs = jnp.where(hs > 1.0, 1.0, hs)    # multilabel clamp (soft labels disabled)

    # ---------------- score normalization (forward) ----------------
    am_pos = align_metric * mask_pos
    pos_align = jnp.max(am_pos, axis=-1, keepdims=True)                      # (N, 1)
    pos_over = jnp.max(overlaps * mask_pos, axis=-1, keepdims=True)          # (N, 1)
    scale = pos_over / (pos_align + eps)                 # tiny (N, 1) exact divide
    norm_align = jnp.max(am_pos * scale, axis=0, keepdims=True)              # (1, A)

    ts_t_ref[0] = hs * norm_align
    fg_ref[0] = fg
    tgi_ref[0] = tgi


def _round_up(x, m):
    return (x + m - 1) // m * m


def _vmem_limit_bytes(A, nc, N):
    """Generation-aware scoped-VMEM budget.

    needed ~= double-buffered pipeline blocks + live (N,A)/(nc,A) f32 temporaries.
    Cap at ~80% of the physical per-core VMEM (v5e/v6e 128 MiB -> ~102 MiB, v7x 64 MiB ->
    ~51 MiB) so Mosaic keeps headroom for internal scratch.
    """
    f32b = 4
    N_p, nc_p = _round_up(N, 8), _round_up(nc, 8)
    pipe_rows = 2 * nc_p + N_p + 32      # ps, ts (nc rows); tgi (N rows); pb/anc/atan/tb/fg
    pipeline = 2 * f32b * (pipe_rows * A + 64 * N_p)
    live = f32b * (20 * N_p * A + 3 * nc_p * A)
    needed = pipeline + live
    cap = None
    try:
        info = pltpu.get_tpu_info()
        cap = int(getattr(info, "vmem_capacity_bytes", 0)) or None
    except Exception:
        cap = None
    if cap is None:
        cap = 64 * 1024 * 1024           # conservative fallback: v7x physical VMEM per core
    budget = (cap * 4) // 5              # ~80% of physical VMEM
    return int(min(max(needed, 32 * 1024 * 1024), budget))


def task_aligned_assigner(pd_scores, pd_bboxes, anc_points, gt_labels, gt_probs,
                          gt_bboxes, mask_gt, *, topk=13, alpha=1.0, beta=6.0,
                          eps=1e-9):
    """Returns (target_bboxes, target_scores, fg_mask, target_gt_idx) like the PyTorch module."""
    del gt_probs  # only used by the use_soft_labels branch (off by default)
    # TODO(synk): use_soft_labels / label_smoothing branches are not implemented (defaults off).
    bs, A, nc = pd_scores.shape
    N = gt_bboxes.shape[1]
    if N == 0:  # replicate torch early-return (ordering as written in the module)
        return (jnp.zeros_like(pd_bboxes), jnp.zeros_like(pd_scores),
                jnp.zeros_like(pd_scores[..., 0]), jnp.zeros_like(pd_scores[..., 0]))

    iou_eps = 1e-7  # bbox_iou default eps

    # Layout glue: everything enters the kernel "anchors on lanes".  pd_scores goes in
    # class-major so the bbox_scores gather is a guaranteed NN MXU matmul and the class
    # axis sits on sublanes (no 80 -> 128 lane padding in VMEM).
    ps_cm = jnp.transpose(pd_scores, (0, 2, 1)).astype(jnp.float32)       # (bs, nc, A)
    pb_t = jnp.transpose(pd_bboxes, (0, 2, 1)).astype(jnp.float32)        # (bs, 4, A)
    anc_t = jnp.transpose(anc_points, (1, 0)).astype(jnp.float32)         # (2, A)

    # glue: arctan(w/h) terms of CIoU precomputed in plain JAX (no atan lowering in Mosaic).
    pw = pd_bboxes[..., 2] - pd_bboxes[..., 0]
    ph = pd_bboxes[..., 3] - pd_bboxes[..., 1] + iou_eps
    pd_atan = jnp.arctan(pw / ph)[:, None, :].astype(jnp.float32)         # (bs, 1, A)
    gw = gt_bboxes[..., 2] - gt_bboxes[..., 0]
    gh = gt_bboxes[..., 3] - gt_bboxes[..., 1] + iou_eps
    gt_atan = jnp.arctan(gw / gh)[..., None].astype(jnp.float32)          # (bs, N, 1)

    gl = gt_labels.astype(jnp.int32)                                       # (bs, N, 1)
    gl_row = jnp.transpose(gl, (0, 2, 1))                                  # (bs, 1, N)
    gb = gt_bboxes.astype(jnp.float32)                                     # (bs, N, 4)
    gb_t8 = jnp.pad(jnp.transpose(gb, (0, 2, 1)), ((0, 0), (0, 4), (0, 0)))  # (bs, 8, N)
    mg = mask_gt.astype(jnp.float32)                                       # (bs, N, 1)

    kernel = functools.partial(
        _tal_kernel, topk=topk, num_classes=nc, alpha=alpha, beta=beta,
        eps=eps, iou_eps=iou_eps, n_max_boxes=N, n_anchors=A)

    # TODO(synk): if the live (N,A)/(nc,A) working set exceeds the v7x budget
    # (A >~ 16k or nc >~ 128), chunk the CIoU / align-metric phase over the anchor axis.
    vmem_limit = _vmem_limit_bytes(A, nc, N)

    # NOTE: grid=(bs,) "parallel" only feeds v7x's second TensorCore when bs >= 2; for
    # bs == 1 half the chip idles (the top-k lane reductions need the full anchor axis, so
    # A cannot simply be split into a second parallel grid axis).
    tb_t, ts_t, fg, tgi = pl.pallas_call(
        kernel,
        grid=(bs,),
        in_specs=[
            pl.BlockSpec((1, nc, A), lambda b: (b, 0, 0)),   # pd_scores (class-major)
            pl.BlockSpec((1, 4, A), lambda b: (b, 0, 0)),    # pd_bboxes (coord-major)
            pl.BlockSpec((2, A), lambda b: (0, 0)),          # anc_points
            pl.BlockSpec((1, 1, A), lambda b: (b, 0, 0)),    # pd atan(w/h)
            pl.BlockSpec((1, N, 1), lambda b: (b, 0, 0)),    # gt_labels (column)
            pl.BlockSpec((1, 1, N), lambda b: (b, 0, 0)),    # gt_labels (row)
            pl.BlockSpec((1, N, 4), lambda b: (b, 0, 0)),    # gt_bboxes
            pl.BlockSpec((1, 8, N), lambda b: (b, 0, 0)),    # gt_bboxes coord-major (padded)
            pl.BlockSpec((1, N, 1), lambda b: (b, 0, 0)),    # gt atan(w/h)
            pl.BlockSpec((1, N, 1), lambda b: (b, 0, 0)),    # mask_gt
        ],
        out_specs=(
            pl.BlockSpec((1, 4, A), lambda b: (b, 0, 0)),    # target_bboxes (coord-major)
            pl.BlockSpec((1, nc, A), lambda b: (b, 0, 0)),   # target_scores (class-major)
            pl.BlockSpec((1, 1, A), lambda b: (b, 0, 0)),    # fg_mask
            pl.BlockSpec((1, N, A), lambda b: (b, 0, 0)),    # target_gt_idx
        ),
        out_shape=(
            jax.ShapeDtypeStruct((bs, 4, A), jnp.float32),
            jax.ShapeDtypeStruct((bs, nc, A), jnp.float32),
            jax.ShapeDtypeStruct((bs, 1, A), jnp.float32),
            jax.ShapeDtypeStruct((bs, N, A), jnp.int32),
        ),
        compiler_params=pltpu.CompilerParams(
            dimension_semantics=("parallel",),
            vmem_limit_bytes=vmem_limit),
    )(ps_cm, pb_t, anc_t, pd_atan, gl, gl_row, gb, gb_t8, gt_atan, mg)

    # TODO(synk): downstream losses could consume ts_t class-major (and fg directly) and
    # skip these HBM transposes; kept to match the PyTorch module's output contract.
    target_bboxes = jnp.transpose(tb_t, (0, 2, 1))       # (bs, A, 4)
    target_scores = jnp.transpose(ts_t, (0, 2, 1))       # (bs, A, nc)
    fg_mask = fg[:, 0, :] > 0.0                          # (bs, A) bool
    # This module's forward returns the (bs, N, A) tensor from its select_highest_overlaps
    # (values n * mask_pos * max_mask); a per-anchor (bs, A) index is tgi.max(1) if needed.
    target_gt_idx = tgi
    return target_bboxes, target_scores, fg_mask, target_gt_idx


if __name__ == "__main__":
    key = jax.random.PRNGKey(0)
    k1, k2, k3, k4, k5, k6 = jax.random.split(key, 6)

    bs, nc, N = 2, 16, 8          # batch, num_classes, n_max_boxes
    S = 16
    A = S * S                     # 256 anchors (16x16 grid, stride 1)

    gx, gy = jnp.meshgrid(jnp.arange(S, dtype=jnp.float32) + 0.5,
                          jnp.arange(S, dtype=jnp.float32) + 0.5, indexing="xy")
    anc_points = jnp.stack([gx.reshape(-1), gy.reshape(-1)], axis=-1)     # (A, 2)

    pd_scores = jax.nn.sigmoid(jax.random.normal(k1, (bs, A, nc), jnp.float32))
    pwh = jax.random.uniform(k2, (bs, A, 2), minval=1.0, maxval=4.0)
    pd_bboxes = jnp.concatenate([anc_points[None] - pwh / 2.0,
                                 anc_points[None] + pwh / 2.0], axis=-1)  # (bs, A, 4)

    cxy = jax.random.uniform(k3, (bs, N, 2), minval=2.0, maxval=14.0)
    gwh = jax.random.uniform(k4, (bs, N, 2), minval=2.0, maxval=6.0)
    gt_bboxes = jnp.concatenate([cxy - gwh / 2.0, cxy + gwh / 2.0], axis=-1)  # (bs, N, 4)
    gt_labels = jax.random.randint(k5, (bs, N, 1), 0, nc).astype(jnp.int32)
    gt_probs = jax.random.uniform(k6, (bs, N, 1), minval=0.5, maxval=1.0)

    # last gt of each image is padding
    mask_gt = jnp.ones((bs, N, 1), jnp.float32).at[:, -1, :].set(0.0)
    gt_bboxes = gt_bboxes * mask_gt
    gt_labels = (gt_labels * mask_gt.astype(jnp.int32))

    outs = task_aligned_assigner(pd_scores, pd_bboxes, anc_points,
                                 gt_labels, gt_probs, gt_bboxes, mask_gt,
                                 topk=13, alpha=1.0, beta=6.0, eps=1e-9)
    jax.block_until_ready(outs)
    tb, ts, fgm, tgi = outs
    assert tb.shape == (bs, A, 4) and ts.shape == (bs, A, nc)
    assert fgm.shape == (bs, A) and tgi.shape == (bs, N, A)
    print("KERNEL_OK")
</pallas_src>

<mosaic_0001>
module attributes {stable_mosaic.version = 11 : i64} {
  func.func @_tal_kernel(%arg0: i32, %arg1: memref<1x16x256xf32, #tpu.memory_space<vmem>>, %arg2: memref<1x4x256xf32, #tpu.memory_space<vmem>>, %arg3: memref<2x256xf32, #tpu.memory_space<vmem>>, %arg4: memref<1x1x256xf32, #tpu.memory_space<vmem>>, %arg5: memref<1x8x1xi32, #tpu.memory_space<vmem>>, %arg6: memref<1x1x8xi32, #tpu.memory_space<vmem>>, %arg7: memref<1x8x4xf32, #tpu.memory_space<vmem>>, %arg8: memref<1x8x8xf32, #tpu.memory_space<vmem>>, %arg9: memref<1x8x1xf32, #tpu.memory_space<vmem>>, %arg10: memref<1x8x1xf32, #tpu.memory_space<vmem>>, %arg11: memref<1x4x256xf32, #tpu.memory_space<vmem>>, %arg12: memref<1x16x256xf32, #tpu.memory_space<vmem>>, %arg13: memref<1x1x256xf32, #tpu.memory_space<vmem>>, %arg14: memref<1x8x256xi32, #tpu.memory_space<vmem>>) attributes {dimension_semantics = [#tpu.dimension_semantics<parallel>], iteration_bounds = array<i64: 2>, scalar_prefetch = 0 : i64, scratch_operands = 0 : i64, tpu.core_type = #tpu.core_type<tc>, window_params = [{transform_indices = @transform_0, window_bounds = array<i64: 1, 16, 256>}, {transform_indices = @transform_1, window_bounds = array<i64: 1, 4, 256>}, {pipeline_mode = #tpu.pipeline_mode<synchronous>, transform_indices = @transform_2, window_bounds = array<i64: 2, 256>}, {transform_indices = @transform_3, window_bounds = array<i64: 1, 1, 256>}, {transform_indices = @transform_4, window_bounds = array<i64: 1, 8, 1>}, {transform_indices = @transform_5, window_bounds = array<i64: 1, 1, 8>}, {transform_indices = @transform_6, window_bounds = array<i64: 1, 8, 4>}, {transform_indices = @transform_7, window_bounds = array<i64: 1, 8, 8>}, {transform_indices = @transform_8, window_bounds = array<i64: 1, 8, 1>}, {transform_indices = @transform_9, window_bounds = array<i64: 1, 8, 1>}, {transform_indices = @transform_10, window_bounds = array<i64: 1, 4, 256>}, {transform_indices = @transform_11, window_bounds = array<i64: 1, 16, 256>}, {transform_indices = @transform_12, window_bounds = array<i64: 1, 1, 256>}, {transform_indices = @transform_13, window_bounds = array<i64: 1, 8, 256>}]} {
    %c0 = arith.constant 0 : index
    %c0_0 = arith.constant 0 : index
    %c0_1 = arith.constant 0 : index
    %0 = vector.load %arg1[%c0, %c0_0, %c0_1] : memref<1x16x256xf32, #tpu.memory_space<vmem>>, vector<1x16x256xf32>
    %1 = vector.shape_cast %0 : vector<1x16x256xf32> to vector<16x256xf32>
    %c0_2 = arith.constant 0 : index
    %c0_3 = arith.constant 0 : index
    %c0_4 = arith.constant 0 : index
    %2 = vector.load %arg2[%c0_2, %c0_3, %c0_4] : memref<1x4x256xf32, #tpu.memory_space<vmem>>, vector<1x4x256xf32>
    %3 = vector.shape_cast %2 : vector<1x4x256xf32> to vector<4x256xf32>
    %c0_5 = arith.constant 0 : index
    %c0_6 = arith.constant 0 : index
    %4 = vector.load %arg3[%c0_5, %c0_6] : memref<2x256xf32, #tpu.memory_space<vmem>>, vector<2x256xf32>
    %c0_7 = arith.constant 0 : index
    %c0_8 = arith.constant 0 : index
    %c0_9 = arith.constant 0 : index
    %5 = vector.load %arg4[%c0_7, %c0_8, %c0_9] : memref<1x1x256xf32, #tpu.memory_space<vmem>>, vector<1x1x256xf32>
    %6 = vector.shape_cast %5 : vector<1x1x256xf32> to vector<1x256xf32>
    %c0_10 = arith.constant 0 : index
    %c0_11 = arith.constant 0 : index
    %c0_12 = arith.constant 0 : index
    %7 = vector.load %arg5[%c0_10, %c0_11, %c0_12] : memref<1x8x1xi32, #tpu.memory_space<vmem>>, vector<1x8x1xi32>
    %8 = vector.shape_cast %7 : vector<1x8x1xi32> to vector<8x1xi32>
    %c0_13 = arith.constant 0 : index
    %c0_14 = arith.constant 0 : index
    %c0_15 = arith.constant 0 : index
    %9 = vector.load %arg6[%c0_13, %c0_14, %c0_15] : memref<1x1x8xi32, #tpu.memory_space<vmem>>, vector<1x1x8xi32>
    %10 = vector.shape_cast %9 : vector<1x1x8xi32> to vector<1x8xi32>
    %c0_16 = arith.constant 0 : index
    %c0_17 = arith.constant 0 : index
    %c0_18 = arith.constant 0 : index
    %11 = vector.load %arg7[%c0_16, %c0_17, %c0_18] : memref<1x8x4xf32, #tpu.memory_space<vmem>>, vector<1x8x4xf32>
    %12 = vector.shape_cast %11 : vector<1x8x4xf32> to vector<8x4xf32>
    %c0_19 = arith.constant 0 : index
    %c0_20 = arith.constant 0 : index
    %c0_21 = arith.constant 0 : index
    %13 = vector.load %arg8[%c0_19, %c0_20, %c0_21] : memref<1x8x8xf32, #tpu.memory_space<vmem>>, vector<1x8x8xf32>
    %14 = vector.shape_cast %13 : vector<1x8x8xf32> to vector<8x8xf32>
    %c0_22 = arith.constant 0 : index
    %c0_23 = arith.constant 0 : index
    %c0_24 = arith.constant 0 : index
    %15 = vector.load %arg9[%c0_22, %c0_23, %c0_24] : memref<1x8x1xf32, #tpu.memory_space<vmem>>, vector<1x8x1xf32>
    %16 = vector.shape_cast %15 : vector<1x8x1xf32> to vector<8x1xf32>
    %c0_25 = arith.constant 0 : index
    %c0_26 = arith.constant 0 : index
    %c0_27 = arith.constant 0 : index
    %17 = vector.load %arg10[%c0_25, %c0_26, %c0_27] : memref<1x8x1xf32, #tpu.memory_space<vmem>>, vector<1x8x1xf32>
    %18 = vector.shape_cast %17 : vector<1x8x1xf32> to vector<8x1xf32>
    %19 = tpu.iota {dimensions = array<i32: 1>} : vector<8x16xi32>
    %20 = vector.broadcast %8 : vector<8x1xi32> to vector<8x16xi32>
    %21 = arith.cmpi eq, %20, %19 : vector<8x16xi32>
    %22 = arith.extui %21 : vector<8x16xi1> to vector<8x16xi32>
    %23 = arith.sitofp %22 : vector<8x16xi32> to vector<8x16xf32>
    %cst = arith.constant dense<0.000000e+00> : vector<8x256xf32>
    %24 = tpu.matmul %23, %1, %cst {dimension_numbers = #tpu.dot_dimension_numbers<[1], [0], [0], [1], [0, 0, 1, 1], [], []>} : vector<8x16xf32>, vector<16x256xf32>, vector<8x256xf32> -> vector<8x256xf32>
    %25 = vector.extract_strided_slice %12 {offsets = [0, 0], sizes = [8, 1], strides = [1, 1]} : vector<8x4xf32> to vector<8x1xf32>
    %26 = vector.extract_strided_slice %12 {offsets = [0, 1], sizes = [8, 1], strides = [1, 1]} : vector<8x4xf32> to vector<8x1xf32>
    %27 = vector.extract_strided_slice %12 {offsets = [0, 2], sizes = [8, 1], strides = [1, 1]} : vector<8x4xf32> to vector<8x1xf32>
    %28 = vector.extract_strided_slice %12 {offsets = [0, 3], sizes = [8, 1], strides = [1, 1]} : vector<8x4xf32> to vector<8x1xf32>
    %29 = vector.extract_strided_slice %3 {offsets = [0, 0], sizes = [1, 256], strides = [1, 1]} : vector<4x256xf32> to vector<1x256xf32>
    %30 = vector.extract_strided_slice %3 {offsets = [1, 0], sizes = [1, 256], strides = [1, 1]} : vector<4x256xf32> to vector<1x256xf32>
    %31 = vector.extract_strided_slice %3 {offsets = [2, 0], sizes = [1, 256], strides = [1, 1]} : vector<4x256xf32> to vector<1x256xf32>
    %32 = vector.extract_strided_slice %3 {offsets = [3, 0], sizes = [1, 256], strides = [1, 1]} : vector<4x256xf32> to vector<1x256xf32>
    %33 = arith.subf %27, %25 : vector<8x1xf32>
    %34 = arith.subf %28, %26 : vector<8x1xf32>
    %cst_28 = arith.constant 1.000000e-07 : f32
    %35 = vector.broadcast %cst_28 : f32 to vector<8x1xf32>
    %36 = arith.addf %34, %35 : vector<8x1xf32>
    %37 = arith.subf %31, %29 : vector<1x256xf32>
    %38 = arith.subf %32, %30 : vector<1x256xf32>
    %cst_29 = arith.constant 1.000000e-07 : f32
    %39 = vector.broadcast %cst_29 : f32 to vector<1x256xf32>
    %40 = arith.addf %38, %39 : vector<1x256xf32>
    %41 = vector.broadcast %27 : vector<8x1xf32> to vector<8x256xf32>
    %42 = vector.broadcast %31 : vector<1x256xf32> to vector<8x256xf32>
    %43 = arith.minimumf %41, %42 : vector<8x256xf32>
    %44 = vector.broadcast %25 : vector<8x1xf32> to vector<8x256xf32>
    %45 = vector.broadcast %29 : vector<1x256xf32> to vector<8x256xf32>
    %46 = arith.maximumf %44, %45 : vector<8x256xf32>
    %47 = arith.subf %43, %46 : vector<8x256xf32>
    %cst_30 = arith.constant 0.000000e+00 : f32
    %48 = vector.broadcast %cst_30 : f32 to vector<8x256xf32>
    %49 = arith.maximumf %47, %48 : vector<8x256xf32>
    %50 = vector.broadcast %28 : vector<8x1xf32> to vector<8x256xf32>
    %51 = vector.broadcast %32 : vector<1x256xf32> to vector<8x256xf32>
    %52 = arith.minimumf %50, %51 : vector<8x256xf32>
    %53 = vector.broadcast %26 : vector<8x1xf32> to vector<8x256xf32>
    %54 = vector.broadcast %30 : vector<1x256xf32> to vector<8x256xf32>
    %55 = arith.maximumf %53, %54 : vector<8x256xf32>
    %56 = arith.subf %52, %55 : vector<8x256xf32>
    %cst_31 = arith.constant 0.000000e+00 : f32
    %57 = vector.broadcast %cst_31 : f32 to vector<8x256xf32>
    %58 = arith.maximumf %56, %57 : vector<8x256xf32>
    %59 = arith.mulf %49, %58 : vector<8x256xf32>
    %60 = arith.mulf %33, %36 : vector<8x1xf32>
    %61 = arith.mulf %37, %40 : vector<1x256xf32>
    %62 = vector.broadcast %60 : vector<8x1xf32> to vector<8x256xf32>
    %63 = vector.broadcast %61 : vector<1x256xf32> to vector<8x256xf32>
    %64 = arith.addf %62, %63 : vector<8x256xf32>
    %65 = arith.subf %64, %59 : vector<8x256xf32>
    %cst_32 = arith.constant 1.000000e-07 : f32
    %66 = vector.broadcast %cst_32 : f32 to vector<8x256xf32>
    %67 = arith.addf %65, %66 : vector<8x256xf32>
    %68 = arith.divf %59, %67 : vector<8x256xf32>
    %69 = vector.broadcast %27 : vector<8x1xf32> to vector<8x256xf32>
    %70 = vector.broadcast %31 : vector<1x256xf32> to vector<8x256xf32>
    %71 = arith.maximumf %69, %70 : vector<8x256xf32>
    %72 = vector.broadcast %25 : vector<8x1xf32> to vector<8x256xf32>
    %73 = vector.broadcast %29 : vector<1x256xf32> to vector<8x256xf32>
    %74 = arith.minimumf %72, %73 : vector<8x256xf32>
    %75 = arith.subf %71, %74 : vector<8x256xf32>
    %76 = vector.broadcast %28 : vector<8x1xf32> to vector<8x256xf32>
    %77 = vector.broadcast %32 : vector<1x256xf32> to vector<8x256xf32>
    %78 = arith.maximumf %76, %77 : vector<8x256xf32>
    %79 = vector.broadcast %26 : vector<8x1xf32> to vector<8x256xf32>
    %80 = vector.broadcast %30 : vector<1x256xf32> to vector<8x256xf32>
    %81 = arith.minimumf %79, %80 : vector<8x256xf32>
    %82 = arith.subf %78, %81 : vector<8x256xf32>
    %83 = arith.mulf %75, %75 : vector<8x256xf32>
    %84 = arith.mulf %82, %82 : vector<8x256xf32>
    %85 = arith.addf %83, %84 : vector<8x256xf32>
    %cst_33 = arith.constant 1.000000e-07 : f32
    %86 = vector.broadcast %cst_33 : f32 to vector<8x256xf32>
    %87 = arith.addf %85, %86 : vector<8x256xf32>
    %88 = arith.addf %29, %31 : vector<1x256xf32>
    %89 = vector.broadcast %88 : vector<1x256xf32> to vector<8x256xf32>
    %90 = vector.broadcast %25 : vector<8x1xf32> to vector<8x256xf32>
    %91 = arith.subf %89, %90 : vector<8x256xf32>
    %92 = vector.broadcast %27 : vector<8x1xf32> to vector<8x256xf32>
    %93 = arith.subf %91, %92 : vector<8x256xf32>
    %94 = arith.addf %30, %32 : vector<1x256xf32>
    %95 = vector.broadcast %94 : vector<1x256xf32> to vector<8x256xf32>
    %96 = vector.broadcast %26 : vector<8x1xf32> to vector<8x256xf32>
    %97 = arith.subf %95, %96 : vector<8x256xf32>
    %98 = vector.broadcast %28 : vector<8x1xf32> to vector<8x256xf32>
    %99 = arith.subf %97, %98 : vector<8x256xf32>
    %100 = arith.mulf %93, %93 : vector<8x256xf32>
    %101 = arith.mulf %99, %99 : vector<8x256xf32>
    %102 = arith.addf %100, %101 : vector<8x256xf32>
    %cst_34 = arith.constant 2.500000e-01 : f32
    %103 = vector.broadcast %cst_34 : f32 to vector<8x256xf32>
    %104 = arith.mulf %102, %103 : vector<8x256xf32>
    %105 = vector.broadcast %6 : vector<1x256xf32> to vector<8x256xf32>
    %106 = vector.broadcast %16 : vector<8x1xf32> to vector<8x256xf32>
    %107 = arith.subf %105, %106 : vector<8x256xf32>
    %cst_35 = arith.constant 0.405284733 : f32
    %108 = vector.broadcast %cst_35 : f32 to vector<8x256xf32>
    %109 = arith.mulf %108, %107 : vector<8x256xf32>
    %110 = arith.mulf %109, %107 : vector<8x256xf32>
    %111 = arith.subf %110, %68 : vector<8x256xf32>
    %cst_36 = arith.constant 1.00000012 : f32
    %112 = vector.broadcast %cst_36 : f32 to vector<8x256xf32>
    %113 = arith.addf %111, %112 : vector<8x256xf32>
    %114 = arith.divf %110, %113 : vector<8x256xf32>
    %115 = arith.divf %104, %87 : vector<8x256xf32>
    %116 = arith.mulf %110, %114 : vector<8x256xf32>
    %117 = arith.addf %115, %116 : vector<8x256xf32>
    %118 = arith.subf %68, %117 : vector<8x256xf32>
    %cst_37 = arith.constant 0.000000e+00 : f32
    %119 = vector.broadcast %cst_37 : f32 to vector<8x256xf32>
    %120 = arith.maximumf %118, %119 : vector<8x256xf32>
    %121 = arith.mulf %120, %120 : vector<8x256xf32>
    %122 = arith.mulf %121, %121 : vector<8x256xf32>
    %123 = arith.mulf %121, %122 : vector<8x256xf32>
    %124 = arith.mulf %24, %123 : vector<8x256xf32>
    %125 = vector.extract_strided_slice %4 {offsets = [0, 0], sizes = [1, 256], strides = [1, 1]} : vector<2x256xf32> to vector<1x256xf32>
    %126 = vector.extract_strided_slice %4 {offsets = [1, 0], sizes = [1, 256], strides = [1, 1]} : vector<2x256xf32> to vector<1x256xf32>
    %127 = vector.broadcast %125 : vector<1x256xf32> to vector<8x256xf32>
    %128 = vector.broadcast %25 : vector<8x1xf32> to vector<8x256xf32>
    %129 = arith.subf %127, %128 : vector<8x256xf32>
    %130 = vector.broadcast %126 : vector<1x256xf32> to vector<8x256xf32>
    %131 = vector.broadcast %26 : vector<8x1xf32> to vector<8x256xf32>
    %132 = arith.subf %130, %131 : vector<8x256xf32>
    %133 = arith.minimumf %129, %132 : vector<8x256xf32>
    %134 = vector.broadcast %27 : vector<8x1xf32> to vector<8x256xf32>
    %135 = vector.broadcast %125 : vector<1x256xf32> to vector<8x256xf32>
    %136 = arith.subf %134, %135 : vector<8x256xf32>
    %137 = vector.broadcast %28 : vector<8x1xf32> to vector<8x256xf32>
    %138 = vector.broadcast %126 : vector<1x256xf32> to vector<8x256xf32>
    %139 = arith.subf %137, %138 : vector<8x256xf32>
    %140 = arith.minimumf %136, %139 : vector<8x256xf32>
    %141 = arith.minimumf %133, %140 : vector<8x256xf32>
    %cst_38 = arith.constant 9.99999971E-10 : f32
    %142 = vector.broadcast %cst_38 : f32 to vector<8x256xf32>
    %143 = arith.cmpf ogt, %141, %142 : vector<8x256xf32>
    %144 = arith.extui %143 : vector<8x256xi1> to vector<8x256xi32>
    %145 = arith.sitofp %144 : vector<8x256xi32> to vector<8x256xf32>
    %146 = arith.mulf %124, %145 : vector<8x256xf32>
    %147 = tpu.iota {dimensions = array<i32: 1>} : vector<8x256xi32>
    %148 = tpu.iota {dimensions = array<i32: 0>} : vector<8x256xi32>
    %cst_39 = arith.constant 0.000000e+00 : f32
    %149 = vector.broadcast %cst_39 : f32 to vector<8x256xf32>
    %cst_40 = arith.constant dense<0xFF800000> : vector<8xf32>
    %150 = vector.multi_reduction <maximumf>, %146, %cst_40 [1] : vector<8x256xf32> to vector<8xf32>
    %151 = vector.shape_cast %150 : vector<8xf32> to vector<8x1xf32>
    %152 = vector.broadcast %151 : vector<8x1xf32> to vector<8x256xf32>
    %153 = arith.cmpf oeq, %146, %152 : vector<8x256xf32>
    %c256_i32 = arith.constant 256 : i32
    %154 = vector.broadcast %c256_i32 : i32 to vector<8x256xi32>
    %155 = arith.select %153, %147, %154 : vector<8x256xi1>, vector<8x256xi32>
    %cst_41 = arith.constant dense<2147483647> : vector<8xi32>
    %156 = vector.multi_reduction <minsi>, %155, %cst_41 [1] : vector<8x256xi32> to vector<8xi32>
    %157 = vector.shape_cast %156 : vector<8xi32> to vector<8x1xi32>
    %158 = vector.broadcast %157 : vector<8x1xi32> to vector<8x256xi32>
    %159 = arith.cmpi eq, %147, %158 : vector<8x256xi32>
    %160 = arith.extui %159 : vector<8x256xi1> to vector<8x256xi32>
    %161 = arith.sitofp %160 : vector<8x256xi32> to vector<8x256xf32>
    %162 = arith.addf %149, %161 : vector<8x256xf32>
    %cst_42 = arith.constant 0xFF800000 : f32
    %163 = vector.broadcast %cst_42 : f32 to vector<8x256xf32>
    %164 = arith.select %159, %163, %146 : vector<8x256xi1>, vector<8x256xf32>
    %cst_43 = arith.constant dense<0xFF800000> : vector<8xf32>
    %165 = vector.multi_reduction <maximumf>, %164, %cst_43 [1] : vector<8x256xf32> to vector<8xf32>
    %166 = vector.shape_cast %165 : vector<8xf32> to vector<8x1xf32>
    %167 = vector.broadcast %166 : vector<8x1xf32> to vector<8x256xf32>
    %168 = arith.cmpf oeq, %164, %167 : vector<8x256xf32>
    %c256_i32_44 = arith.constant 256 : i32
    %169 = vector.broadcast %c256_i32_44 : i32 to vector<8x256xi32>
    %170 = arith.select %168, %147, %169 : vector<8x256xi1>, vector<8x256xi32>
    %cst_45 = arith.constant dense<2147483647> : vector<8xi32>
    %171 = vector.multi_reduction <minsi>, %170, %cst_45 [1] : vector<8x256xi32> to vector<8xi32>
    %172 = vector.shape_cast %171 : vector<8xi32> to vector<8x1xi32>
    %173 = vector.broadcast %172 : vector<8x1xi32> to vector<8x256xi32>
    %174 = arith.cmpi eq, %147, %173 : vector<8x256xi32>
    %175 = arith.extui %174 : vector<8x256xi1> to vector<8x256xi32>
    %176 = arith.sitofp %175 : vector<8x256xi32> to vector<8x256xf32>
    %177 = arith.addf %162, %176 : vector<8x256xf32>
    %cst_46 = arith.constant 0xFF800000 : f32
    %178 = vector.broadcast %cst_46 : f32 to vector<8x256xf32>
    %179 = arith.select %174, %178, %164 : vector<8x256xi1>, vector<8x256xf32>
    %cst_47 = arith.constant dense<0xFF800000> : vector<8xf32>
    %180 = vector.multi_reduction <maximumf>, %179, %cst_47 [1] : vector<8x256xf32> to vector<8xf32>
    %181 = vector.shape_cast %180 : vector<8xf32> to vector<8x1xf32>
    %182 = vector.broadcast %181 : vector<8x1xf32> to vector<8x256xf32>
    %183 = arith.cmpf oeq, %179, %182 : vector<8x256xf32>
    %c256_i32_48 = arith.constant 256 : i32
    %184 = vector.broadcast %c256_i32_48 : i32 to vector<8x256xi32>
    %185 = arith.select %183, %147, %184 : vector<8x256xi1>, vector<8x256xi32>
    %cst_49 = arith.constant dense<2147483647> : vector<8xi32>
    %186 = vector.multi_reduction <minsi>, %185, %cst_49 [1] : vector<8x256xi32> to vector<8xi32>
    %187 = vector.shape_cast %186 : vector<8xi32> to vector<8x1xi32>
    %188 = vector.broadcast %187 : vector<8x1xi32> to vector<8x256xi32>
    %189 = arith.cmpi eq, %147, %188 : vector<8x256xi32>
    %190 = arith.extui %189 : vector<8x256xi1> to vector<8x256xi32>
    %191 = arith.sitofp %190 : vector<8x256xi32> to vector<8x256xf32>
    %192 = arith.addf %177, %191 : vector<8x256xf32>
    %cst_50 = arith.constant 0xFF800000 : f32
    %193 = vector.broadcast %cst_50 : f32 to vector<8x256xf32>
    %194 = arith.select %189, %193, %179 : vector<8x256xi1>, vector<8x256xf32>
    %cst_51 = arith.constant dense<0xFF800000> : vector<8xf32>
    %195 = vector.multi_reduction <maximumf>, %194, %cst_51 [1] : vector<8x256xf32> to vector<8xf32>
    %196 = vector.shape_cast %195 : vector<8xf32> to vector<8x1xf32>
    %197 = vector.broadcast %196 : vector<8x1xf32> to vector<8x256xf32>
    %198 = arith.cmpf oeq, %194, %197 : vector<8x256xf32>
    %c256_i32_52 = arith.constant 256 : i32
    %199 = vector.broadcast %c256_i32_52 : i32 to vector<8x256xi32>
    %200 = arith.select %198, %147, %199 : vector<8x256xi1>, vector<8x256xi32>
    %cst_53 = arith.constant dense<2147483647> : vector<8xi32>
    %201 = vector.multi_reduction <minsi>, %200, %cst_53 [1] : vector<8x256xi32> to vector<8xi32>
    %202 = vector.shape_cast %201 : vector<8xi32> to vector<8x1xi32>
    %203 = vector.broadcast %202 : vector<8x1xi32> to vector<8x256xi32>
    %204 = arith.cmpi eq, %147, %203 : vector<8x256xi32>
    %205 = arith.extui %204 : vector<8x256xi1> to vector<8x256xi32>
    %206 = arith.sitofp %205 : vector<8x256xi32> to vector<8x256xf32>
    %207 = arith.addf %192, %206 : vector<8x256xf32>
    %cst_54 = arith.constant 0xFF800000 : f32
    %208 = vector.broadcast %cst_54 : f32 to vector<8x256xf32>
    %209 = arith.select %204, %208, %194 : vector<8x256xi1>, vector<8x256xf32>
    %cst_55 = arith.constant dense<0xFF800000> : vector<8xf32>
    %210 = vector.multi_reduction <maximumf>, %209, %cst_55 [1] : vector<8x256xf32> to vector<8xf32>
    %211 = vector.shape_cast %210 : vector<8xf32> to vector<8x1xf32>
    %212 = vector.broadcast %211 : vector<8x1xf32> to vector<8x256xf32>
    %213 = arith.cmpf oeq, %209, %212 : vector<8x256xf32>
    %c256_i32_56 = arith.constant 256 : i32
    %214 = vector.broadcast %c256_i32_56 : i32 to vector<8x256xi32>
    %215 = arith.select %213, %147, %214 : vector<8x256xi1>, vector<8x256xi32>
    %cst_57 = arith.constant dense<2147483647> : vector<8xi32>
    %216 = vector.multi_reduction <minsi>, %215, %cst_57 [1] : vector<8x256xi32> to vector<8xi32>
    %217 = vector.shape_cast %216 : vector<8xi32> to vector<8x1xi32>
    %218 = vector.broadcast %217 : vector<8x1xi32> to vector<8x256xi32>
    %219 = arith.cmpi eq, %147, %218 : vector<8x256xi32>
    %220 = arith.extui %219 : vector<8x256xi1> to vector<8x256xi32>
    %221 = arith.sitofp %220 : vector<8x256xi32> to vector<8x256xf32>
    %222 = arith.addf %207, %221 : vector<8x256xf32>
    %cst_58 = arith.constant 0xFF800000 : f32
    %223 = vector.broadcast %cst_58 : f32 to vector<8x256xf32>
    %224 = arith.select %219, %223, %209 : vector<8x256xi1>, vector<8x256xf32>
    %cst_59 = arith.constant dense<0xFF800000> : vector<8xf32>
    %225 = vector.multi_reduction <maximumf>, %224, %cst_59 [1] : vector<8x256xf32> to vector<8xf32>
    %226 = vector.shape_cast %225 : vector<8xf32> to vector<8x1xf32>
    %227 = vector.broadcast %226 : vector<8x1xf32> to vector<8x256xf32>
    %228 = arith.cmpf oeq, %224, %227 : vector<8x256xf32>
    %c256_i32_60 = arith.constant 256 : i32
    %229 = vector.broadcast %c256_i32_60 : i32 to vector<8x256xi32>
    %230 = arith.select %228, %147, %229 : vector<8x256xi1>, vector<8x256xi32>
    %cst_61 = arith.constant dense<2147483647> : vector<8xi32>
    %231 = vector.multi_reduction <minsi>, %230, %cst_61 [1] : vector<8x256xi32> to vector<8xi32>
    %232 = vector.shape_cast %231 : vector<8xi32> to vector<8x1xi32>
    %233 = vector.broadcast %232 : vector<8x1xi32> to vector<8x256xi32>
    %234 = arith.cmpi eq, %147, %233 : vector<8x256xi32>
    %235 = arith.extui %234 : vector<8x256xi1> to vector<8x256xi32>
    %236 = arith.sitofp %235 : vector<8x256xi32> to vector<8x256xf32>
    %237 = arith.addf %222, %236 : vector<8x256xf32>
    %cst_62 = arith.constant 0xFF800000 : f32
    %238 = vector.broadcast %cst_62 : f32 to vector<8x256xf32>
    %239 = arith.select %234, %238, %224 : vector<8x256xi1>, vector<8x256xf32>
    %cst_63 = arith.constant dense<0xFF800000> : vector<8xf32>
    %240 = vector.multi_reduction <maximumf>, %239, %cst_63 [1] : vector<8x256xf32> to vector<8xf32>
    %241 = vector.shape_cast %240 : vector<8xf32> to vector<8x1xf32>
    %242 = vector.broadcast %241 : vector<8x1xf32> to vector<8x256xf32>
    %243 = arith.cmpf oeq, %239, %242 : vector<8x256xf32>
    %c256_i32_64 = arith.constant 256 : i32
    %244 = vector.broadcast %c256_i32_64 : i32 to vector<8x256xi32>
    %245 = arith.select %243, %147, %244 : vector<8x256xi1>, vector<8x256xi32>
    %cst_65 = arith.constant dense<2147483647> : vector<8xi32>
    %246 = vector.multi_reduction <minsi>, %245, %cst_65 [1] : vector<8x256xi32> to vector<8xi32>
    %247 = vector.shape_cast %246 : vector<8xi32> to vector<8x1xi32>
    %248 = vector.broadcast %247 : vector<8x1xi32> to vector<8x256xi32>
    %249 = arith.cmpi eq, %147, %248 : vector<8x256xi32>
    %250 = arith.extui %249 : vector<8x256xi1> to vector<8x256xi32>
    %251 = arith.sitofp %250 : vector<8x256xi32> to vector<8x256xf32>
    %252 = arith.addf %237, %251 : vector<8x256xf32>
    %cst_66 = arith.constant 0xFF800000 : f32
    %253 = vector.broadcast %cst_66 : f32 to vector<8x256xf32>
    %254 = arith.select %249, %253, %239 : vector<8x256xi1>, vector<8x256xf32>
    %cst_67 = arith.constant dense<0xFF800000> : vector<8xf32>
    %255 = vector.multi_reduction <maximumf>, %254, %cst_67 [1] : vector<8x256xf32> to vector<8xf32>
    %256 = vector.shape_cast %255 : vector<8xf32> to vector<8x1xf32>
    %257 = vector.broadcast %256 : vector<8x1xf32> to vector<8x256xf32>
    %258 = arith.cmpf oeq, %254, %257 : vector<8x256xf32>
    %c256_i32_68 = arith.constant 256 : i32
    %259 = vector.broadcast %c256_i32_68 : i32 to vector<8x256xi32>
    %260 = arith.select %258, %147, %259 : vector<8x256xi1>, vector<8x256xi32>
    %cst_69 = arith.constant dense<2147483647> : vector<8xi32>
    %261 = vector.multi_reduction <minsi>, %260, %cst_69 [1] : vector<8x256xi32> to vector<8xi32>
    %262 = vector.shape_cast %261 : vector<8xi32> to vector<8x1xi32>
    %263 = vector.broadcast %262 : vector<8x1xi32> to vector<8x256xi32>
    %264 = arith.cmpi eq, %147, %263 : vector<8x256xi32>
    %265 = arith.extui %264 : vector<8x256xi1> to vector<8x256xi32>
    %266 = arith.sitofp %265 : vector<8x256xi32> to vector<8x256xf32>
    %267 = arith.addf %252, %266 : vector<8x256xf32>
    %cst_70 = arith.constant 0xFF800000 : f32
    %268 = vector.broadcast %cst_70 : f32 to vector<8x256xf32>
    %269 = arith.select %264, %268, %254 : vector<8x256xi1>, vector<8x256xf32>
    %cst_71 = arith.constant dense<0xFF800000> : vector<8xf32>
    %270 = vector.multi_reduction <maximumf>, %269, %cst_71 [1] : vector<8x256xf32> to vector<8xf32>
    %271 = vector.shape_cast %270 : vector<8xf32> to vector<8x1xf32>
    %272 = vector.broadcast %271 : vector<8x1xf32> to vector<8x256xf32>
    %273 = arith.cmpf oeq, %269, %272 : vector<8x256xf32>
    %c256_i32_72 = arith.constant 256 : i32
    %274 = vector.broadcast %c256_i32_72 : i32 to vector<8x256xi32>
    %275 = arith.select %273, %147, %274 : vector<8x256xi1>, vector<8x256xi32>
    %cst_73 = arith.constant dense<2147483647> : vector<8xi32>
    %276 = vector.multi_reduction <minsi>, %275, %cst_73 [1] : vector<8x256xi32> to vector<8xi32>
    %277 = vector.shape_cast %276 : vector<8xi32> to vector<8x1xi32>
    %278 = vector.broadcast %277 : vector<8x1xi32> to vector<8x256xi32>
    %279 = arith.cmpi eq, %147, %278 : vector<8x256xi32>
    %280 = arith.extui %279 : vector<8x256xi1> to vector<8x256xi32>
    %281 = arith.sitofp %280 : vector<8x256xi32> to vector<8x256xf32>
    %282 = arith.addf %267, %281 : vector<8x256xf32>
    %cst_74 = arith.constant 0xFF800000 : f32
    %283 = vector.broadcast %cst_74 : f32 to vector<8x256xf32>
    %284 = arith.select %279, %283, %269 : vector<8x256xi1>, vector<8x256xf32>
    %cst_75 = arith.constant dense<0xFF800000> : vector<8xf32>
    %285 = vector.multi_reduction <maximumf>, %284, %cst_75 [1] : vector<8x256xf32> to vector<8xf32>
    %286 = vector.shape_cast %285 : vector<8xf32> to vector<8x1xf32>
    %287 = vector.broadcast %286 : vector<8x1xf32> to vector<8x256xf32>
    %288 = arith.cmpf oeq, %284, %287 : vector<8x256xf32>
    %c256_i32_76 = arith.constant 256 : i32
    %289 = vector.broadcast %c256_i32_76 : i32 to vector<8x256xi32>
    %290 = arith.select %288, %147, %289 : vector<8x256xi1>, vector<8x256xi32>
    %cst_77 = arith.constant dense<2147483647> : vector<8xi32>
    %291 = vector.multi_reduction <minsi>, %290, %cst_77 [1] : vector<8x256xi32> to vector<8xi32>
    %292 = vector.shape_cast %291 : vector<8xi32> to vector<8x1xi32>
    %293 = vector.broadcast %292 : vector<8x1xi32> to vector<8x256xi32>
    %294 = arith.cmpi eq, %147, %293 : vector<8x256xi32>
    %295 = arith.extui %294 : vector<8x256xi1> to vector<8x256xi32>
    %296 = arith.sitofp %295 : vector<8x256xi32> to vector<8x256xf32>
    %297 = arith.addf %282, %296 : vector<8x256xf32>
    %cst_78 = arith.constant 0xFF800000 : f32
    %298 = vector.broadcast %cst_78 : f32 to vector<8x256xf32>
    %299 = arith.select %294, %298, %284 : vector<8x256xi1>, vector<8x256xf32>
    %cst_79 = arith.constant dense<0xFF800000> : vector<8xf32>
    %300 = vector.multi_reduction <maximumf>, %299, %cst_79 [1] : vector<8x256xf32> to vector<8xf32>
    %301 = vector.shape_cast %300 : vector<8xf32> to vector<8x1xf32>
    %302 = vector.broadcast %301 : vector<8x1xf32> to vector<8x256xf32>
    %303 = arith.cmpf oeq, %299, %302 : vector<8x256xf32>
    %c256_i32_80 = arith.constant 256 : i32
    %304 = vector.broadcast %c256_i32_80 : i32 to vector<8x256xi32>
    %305 = arith.select %303, %147, %304 : vector<8x256xi1>, vector<8x256xi32>
    %cst_81 = arith.constant dense<2147483647> : vector<8xi32>
    %306 = vector.multi_reduction <minsi>, %305, %cst_81 [1] : vector<8x256xi32> to vector<8xi32>
    %307 = vector.shape_cast %306 : vector<8xi32> to vector<8x1xi32>
    %308 = vector.broadcast %307 : vector<8x1xi32> to vector<8x256xi32>
    %309 = arith.cmpi eq, %147, %308 : vector<8x256xi32>
    %310 = arith.extui %309 : vector<8x256xi1> to vector<8x256xi32>
    %311 = arith.sitofp %310 : vector<8x256xi32> to vector<8x256xf32>
    %312 = arith.addf %297, %311 : vector<8x256xf32>
    %cst_82 = arith.constant 0xFF800000 : f32
    %313 = vector.broadcast %cst_82 : f32 to vector<8x256xf32>
    %314 = arith.select %309, %313, %299 : vector<8x256xi1>, vector<8x256xf32>
    %cst_83 = arith.constant dense<0xFF800000> : vector<8xf32>
    %315 = vector.multi_reduction <maximumf>, %314, %cst_83 [1] : vector<8x256xf32> to vector<8xf32>
    %316 = vector.shape_cast %315 : vector<8xf32> to vector<8x1xf32>
    %317 = vector.broadcast %316 : vector<8x1xf32> to vector<8x256xf32>
    %318 = arith.cmpf oeq, %314, %317 : vector<8x256xf32>
    %c256_i32_84 = arith.constant 256 : i32
    %319 = vector.broadcast %c256_i32_84 : i32 to vector<8x256xi32>
    %320 = arith.select %318, %147, %319 : vector<8x256xi1>, vector<8x256xi32>
    %cst_85 = arith.constant dense<2147483647> : vector<8xi32>
    %321 = vector.multi_reduction <minsi>, %320, %cst_85 [1] : vector<8x256xi32> to vector<8xi32>
    %322 = vector.shape_cast %321 : vector<8xi32> to vector<8x1xi32>
    %323 = vector.broadcast %322 : vector<8x1xi32> to vector<8x256xi32>
    %324 = arith.cmpi eq, %147, %323 : vector<8x256xi32>
    %325 = arith.extui %324 : vector<8x256xi1> to vector<8x256xi32>
    %326 = arith.sitofp %325 : vector<8x256xi32> to vector<8x256xf32>
    %327 = arith.addf %312, %326 : vector<8x256xf32>
    %cst_86 = arith.constant 0xFF800000 : f32
    %328 = vector.broadcast %cst_86 : f32 to vector<8x256xf32>
    %329 = arith.select %324, %328, %314 : vector<8x256xi1>, vector<8x256xf32>
    %cst_87 = arith.constant dense<0xFF800000> : vector<8xf32>
    %330 = vector.multi_reduction <maximumf>, %329, %cst_87 [1] : vector<8x256xf32> to vector<8xf32>
    %331 = vector.shape_cast %330 : vector<8xf32> to vector<8x1xf32>
    %332 = vector.broadcast %331 : vector<8x1xf32> to vector<8x256xf32>
    %333 = arith.cmpf oeq, %329, %332 : vector<8x256xf32>
    %c256_i32_88 = arith.constant 256 : i32
    %334 = vector.broadcast %c256_i32_88 : i32 to vector<8x256xi32>
    %335 = arith.select %333, %147, %334 : vector<8x256xi1>, vector<8x256xi32>
    %cst_89 = arith.constant dense<2147483647> : vector<8xi32>
    %336 = vector.multi_reduction <minsi>, %335, %cst_89 [1] : vector<8x256xi32> to vector<8xi32>
    %337 = vector.shape_cast %336 : vector<8xi32> to vector<8x1xi32>
    %338 = vector.broadcast %337 : vector<8x1xi32> to vector<8x256xi32>
    %339 = arith.cmpi eq, %147, %338 : vector<8x256xi32>
    %340 = arith.extui %339 : vector<8x256xi1> to vector<8x256xi32>
    %341 = arith.sitofp %340 : vector<8x256xi32> to vector<8x256xf32>
    %342 = arith.addf %327, %341 : vector<8x256xf32>
    %343 = arith.mulf %342, %145 : vector<8x256xf32>
    %344 = vector.broadcast %18 : vector<8x1xf32> to vector<8x256xf32>
    %345 = arith.mulf %343, %344 : vector<8x256xf32>
    %cst_90 = arith.constant dense<0xFF800000> : vector<256xf32>
    %346 = vector.multi_reduction <maximumf>, %120, %cst_90 [0] : vector<8x256xf32> to vector<256xf32>
    %347 = vector.shape_cast %346 : vector<256xf32> to vector<1x256xf32>
    %348 = vector.broadcast %347 : vector<1x256xf32> to vector<8x256xf32>
    %349 = arith.cmpf oeq, %120, %348 : vector<8x256xf32>
    %350 = arith.extui %349 : vector<8x256xi1> to vector<8x256xi32>
    %351 = arith.sitofp %350 : vector<8x256xi32> to vector<8x256xf32>
    %352 = arith.mulf %345, %351 : vector<8x256xf32>
    %353 = arith.fptosi %352 : vector<8x256xf32> to vector<8x256xi32>
    %354 = arith.muli %148, %353 : vector<8x256xi32>
    %cst_91 = arith.constant dense<0.000000e+00> : vector<256xf32>
    %355 = vector.multi_reduction <add>, %345, %cst_91 [0] : vector<8x256xf32> to vector<256xf32>
    %356 = vector.shape_cast %355 : vector<256xf32> to vector<1x256xf32>
    %cst_92 = arith.constant dense<-2147483648> : vector<256xi32>
    %357 = vector.multi_reduction <maxsi>, %354, %cst_92 [0] : vector<8x256xi32> to vector<256xi32>
    %358 = vector.shape_cast %357 : vector<256xi32> to vector<1x256xi32>
    %359 = vector.broadcast %358 : vector<1x256xi32> to vector<8x256xi32>
    %360 = arith.cmpi eq, %148, %359 : vector<8x256xi32>
    %361 = arith.extui %360 : vector<8x256xi1> to vector<8x256xi32>
    %362 = arith.sitofp %361 : vector<8x256xi32> to vector<8x256xf32>
    %cst_93 = arith.constant dense<0.000000e+00> : vector<8x256xf32>
    %363 = tpu.matmul %14, %362, %cst_93 {dimension_numbers = #tpu.dot_dimension_numbers<[1], [0], [0], [1], [0, 0, 1, 1], [], []>} : vector<8x8xf32>, vector<8x256xf32>, vector<8x256xf32> -> vector<8x256xf32>
    %364 = vector.extract_strided_slice %363 {offsets = [0, 0], sizes = [4, 256], strides = [1, 1]} : vector<8x256xf32> to vector<4x256xf32>
    %c0_94 = arith.constant 0 : index
    %c0_95 = arith.constant 0 : index
    %c0_96 = arith.constant 0 : index
    %365 = vector.load %arg11[%c0_94, %c0_95, %c0_96] : memref<1x4x256xf32, #tpu.memory_space<vmem>>, vector<1x4x256xf32>
    %366 = vector.shape_cast %365 : vector<1x4x256xf32> to vector<4x256xf32>
    %367 = vector.shape_cast %364 : vector<4x256xf32> to vector<1x4x256xf32>
    tpu.vector_store %arg11[%c0_94, %c0_95, %c0_96], %367 {strides = array<i32>} : memref<1x4x256xf32, #tpu.memory_space<vmem>>, vector<1x4x256xf32>,
    %cst_97 = arith.constant dense<0.000000e+00> : vector<256xf32>
    %368 = vector.multi_reduction <add>, %352, %cst_97 [0] : vector<8x256xf32> to vector<256xf32>
    %369 = vector.shape_cast %368 : vector<256xf32> to vector<1x256xf32>
    %c0_i32 = arith.constant 0 : i32
    %370 = vector.broadcast %c0_i32 : i32 to vector<8x256xi32>
    %371 = arith.cmpi eq, %148, %370 : vector<8x256xi32>
    %cst_98 = arith.constant 8.000000e+00 : f32
    %372 = vector.broadcast %cst_98 : f32 to vector<1x256xf32>
    %373 = arith.subf %372, %369 : vector<1x256xf32>
    %374 = vector.broadcast %373 : vector<1x256xf32> to vector<8x256xf32>
    %375 = arith.addf %374, %352 : vector<8x256xf32>
    %376 = arith.select %371, %375, %352 : vector<8x256xi1>, vector<8x256xf32>
    %377 = tpu.iota {dimensions = array<i32: 0>} : vector<16x8xi32>
    %378 = vector.broadcast %10 : vector<1x8xi32> to vector<16x8xi32>
    %379 = arith.cmpi eq, %378, %377 : vector<16x8xi32>
    %380 = arith.extui %379 : vector<16x8xi1> to vector<16x8xi32>
    %381 = arith.sitofp %380 : vector<16x8xi32> to vector<16x8xf32>
    %cst_99 = arith.constant dense<0.000000e+00> : vector<16x256xf32>
    %382 = tpu.matmul %381, %376, %cst_99 {dimension_numbers = #tpu.dot_dimension_numbers<[1], [0], [0], [1], [0, 0, 1, 1], [], []>} : vector<16x8xf32>, vector<8x256xf32>, vector<16x256xf32> -> vector<16x256xf32>
    %cst_100 = arith.constant dense<0.000000e+00> : vector<16xf32>
    %383 = vector.multi_reduction <add>, %382, %cst_100 [1] : vector<16x256xf32> to vector<16xf32>
    %384 = vector.shape_cast %383 : vector<16xf32> to vector<16x1xf32>
    %385 = tpu.iota {dimensions = array<i32: 0>} : vector<16x1xi32>
    %cst_101 = arith.constant dense<0xFF800000> : vector<1xf32>
    %386 = vector.multi_reduction <maximumf>, %384, %cst_101 [0] : vector<16x1xf32> to vector<1xf32>
    %387 = vector.shape_cast %386 : vector<1xf32> to vector<1x1xf32>
    %388 = vector.broadcast %387 : vector<1x1xf32> to vector<16x1xf32>
    %389 = arith.cmpf oeq, %384, %388 : vector<16x1xf32>
    %c16_i32 = arith.constant 16 : i32
    %390 = vector.broadcast %c16_i32 : i32 to vector<16x1xi32>
    %391 = arith.select %389, %385, %390 : vector<16x1xi1>, vector<16x1xi32>
    %cst_102 = arith.constant dense<2147483647> : vector<1xi32>
    %392 = vector.multi_reduction <minsi>, %391, %cst_102 [0] : vector<16x1xi32> to vector<1xi32>
    %393 = vector.shape_cast %392 : vector<1xi32> to vector<1x1xi32>
    %394 = vector.broadcast %393 : vector<1x1xi32> to vector<16x1xi32>
    %395 = arith.cmpi eq, %385, %394 : vector<16x1xi32>
    %396 = arith.extui %395 : vector<16x1xi1> to vector<16x1xi32>
    %397 = arith.sitofp %396 : vector<16x1xi32> to vector<16x1xf32>
    %cst_103 = arith.constant 1.000000e+00 : f32
    %398 = vector.broadcast %cst_103 : f32 to vector<16x1xf32>
    %399 = arith.subf %398, %397 : vector<16x1xf32>
    %400 = vector.broadcast %399 : vector<16x1xf32> to vector<16x256xf32>
    %401 = arith.mulf %382, %400 : vector<16x256xf32>
    %cst_104 = arith.constant dense<0.000000e+00> : vector<256xf32>
    %402 = vector.multi_reduction <add>, %401, %cst_104 [0] : vector<16x256xf32> to vector<256xf32>
    %403 = vector.shape_cast %402 : vector<256xf32> to vector<1x256xf32>
    %cst_105 = arith.constant 8.000000e+00 : f32
    %404 = vector.broadcast %cst_105 : f32 to vector<1x256xf32>
    %405 = arith.subf %404, %403 : vector<1x256xf32>
    %cst_106 = arith.constant 8.000000e+00 : f32
    %406 = vector.broadcast %cst_106 : f32 to vector<1x256xf32>
    %407 = arith.subf %406, %356 : vector<1x256xf32>
    %408 = arith.subf %405, %407 : vector<1x256xf32>
    %409 = arith.subf %356, %403 : vector<1x256xf32>
    %cst_107 = arith.constant 0.000000e+00 : f32
    %410 = vector.broadcast %cst_107 : f32 to vector<1x256xf32>
    %411 = arith.cmpf one, %409, %410 : vector<1x256xf32>
    %cst_108 = arith.constant 1.000000e+00 : f32
    %412 = vector.broadcast %cst_108 : f32 to vector<1x256xf32>
    %413 = arith.select %411, %409, %412 : vector<1x256xi1>, vector<1x256xf32>
    %414 = arith.divf %408, %413 : vector<1x256xf32>
    %cst_109 = arith.constant 0.000000e+00 : f32
    %415 = vector.broadcast %cst_109 : f32 to vector<1x256xf32>
    %416 = arith.cmpf oge, %414, %415 : vector<1x256xf32>
    %417 = math.floor %414 : vector<1x256xf32>
    %cst_110 = arith.constant 0.000000e+00 : f32
    %418 = vector.broadcast %cst_110 : f32 to vector<1x256xf32>
    %419 = arith.subf %418, %414 : vector<1x256xf32>
    %420 = math.floor %419 : vector<1x256xf32>
    %cst_111 = arith.constant 0.000000e+00 : f32
    %421 = vector.broadcast %cst_111 : f32 to vector<1x256xf32>
    %422 = arith.subf %421, %420 : vector<1x256xf32>
    %423 = arith.select %416, %417, %422 : vector<1x256xi1>, vector<1x256xf32>
    %424 = arith.select %411, %423, %408 : vector<1x256xi1>, vector<1x256xf32>
    %cst_112 = arith.constant 0.000000e+00 : f32
    %425 = vector.broadcast %cst_112 : f32 to vector<16x1xf32>
    %426 = arith.cmpf ogt, %397, %425 : vector<16x1xf32>
    %427 = vector.shape_cast %426 : vector<16x1xi1> to vector<16x1xi1>
    %428 = vector.broadcast %427 : vector<16x1xi1> to vector<16x256xi1>
    %429 = vector.shape_cast %424 : vector<1x256xf32> to vector<1x256xf32>
    %430 = vector.broadcast %429 : vector<1x256xf32> to vector<16x256xf32>
    %431 = arith.select %428, %430, %382 : vector<16x256xi1>, vector<16x256xf32>
    %cst_113 = arith.constant 1.000000e+00 : f32
    %432 = vector.broadcast %cst_113 : f32 to vector<16x256xf32>
    %433 = arith.cmpf ogt, %431, %432 : vector<16x256xf32>
    %cst_114 = arith.constant 1.000000e+00 : f32
    %434 = vector.broadcast %cst_114 : f32 to vector<16x256xf32>
    %435 = arith.select %433, %434, %431 : vector<16x256xi1>, vector<16x256xf32>
    %436 = arith.mulf %124, %345 : vector<8x256xf32>
    %cst_115 = arith.constant dense<0xFF800000> : vector<8xf32>
    %437 = vector.multi_reduction <maximumf>, %436, %cst_115 [1] : vector<8x256xf32> to vector<8xf32>
    %438 = vector.shape_cast %437 : vector<8xf32> to vector<8x1xf32>
    %439 = arith.mulf %120, %345 : vector<8x256xf32>
    %cst_116 = arith.constant dense<0xFF800000> : vector<8xf32>
    %440 = vector.multi_reduction <maximumf>, %439, %cst_116 [1] : vector<8x256xf32> to vector<8xf32>
    %441 = vector.shape_cast %440 : vector<8xf32> to vector<8x1xf32>
    %cst_117 = arith.constant 9.99999971E-10 : f32
    %442 = vector.broadcast %cst_117 : f32 to vector<8x1xf32>
    %443 = arith.addf %438, %442 : vector<8x1xf32>
    %444 = arith.divf %441, %443 : vector<8x1xf32>
    %445 = vector.broadcast %444 : vector<8x1xf32> to vector<8x256xf32>
    %446 = arith.mulf %436, %445 : vector<8x256xf32>
    %cst_118 = arith.constant dense<0xFF800000> : vector<256xf32>
    %447 = vector.multi_reduction <maximumf>, %446, %cst_118 [0] : vector<8x256xf32> to vector<256xf32>
    %448 = vector.shape_cast %447 : vector<256xf32> to vector<1x256xf32>
    %449 = vector.broadcast %448 : vector<1x256xf32> to vector<16x256xf32>
    %450 = arith.mulf %435, %449 : vector<16x256xf32>
    %c0_119 = arith.constant 0 : index
    %c0_120 = arith.constant 0 : index
    %c0_121 = arith.constant 0 : index
    %451 = vector.load %arg12[%c0_119, %c0_120, %c0_121] : memref<1x16x256xf32, #tpu.memory_space<vmem>>, vector<1x16x256xf32>
    %452 = vector.shape_cast %451 : vector<1x16x256xf32> to vector<16x256xf32>
    %453 = vector.shape_cast %450 : vector<16x256xf32> to vector<1x16x256xf32>
    tpu.vector_store %arg12[%c0_119, %c0_120, %c0_121], %453 {strides = array<i32>} : memref<1x16x256xf32, #tpu.memory_space<vmem>>, vector<1x16x256xf32>,
    %c0_122 = arith.constant 0 : index
    %c0_123 = arith.constant 0 : index
    %c0_124 = arith.constant 0 : index
    %454 = vector.load %arg13[%c0_122, %c0_123, %c0_124] : memref<1x1x256xf32, #tpu.memory_space<vmem>>, vector<1x1x256xf32>
    %455 = vector.shape_cast %454 : vector<1x1x256xf32> to vector<1x256xf32>
    %456 = vector.shape_cast %356 : vector<1x256xf32> to vector<1x1x256xf32>
    tpu.vector_store %arg13[%c0_122, %c0_123, %c0_124], %456 {strides = array<i32>} : memref<1x1x256xf32, #tpu.memory_space<vmem>>, vector<1x1x256xf32>,
    %c0_125 = arith.constant 0 : index
    %c0_126 = arith.constant 0 : index
    %c0_127 = arith.constant 0 : index
    %457 = vector.load %arg14[%c0_125, %c0_126, %c0_127] : memref<1x8x256xi32, #tpu.memory_space<vmem>>, vector<1x8x256xi32>
    %458 = vector.shape_cast %457 : vector<1x8x256xi32> to vector<8x256xi32>
    %459 = vector.shape_cast %354 : vector<8x256xi32> to vector<1x8x256xi32>
    tpu.vector_store %arg14[%c0_125, %c0_126, %c0_127], %459 {strides = array<i32>} : memref<1x8x256xi32, #tpu.memory_space<vmem>>, vector<1x8x256xi32>,
    return
  }
  func.func @transform_0(%arg0: i32) -> (i32, i32, i32) {
    %c0_i32 = arith.constant 0 : i32
    %c0_i32_0 = arith.constant 0 : i32
    %c0_i32_1 = arith.constant 0 : i32
    return %arg0, %c0_i32, %c0_i32_0 : i32, i32, i32
  }
  func.func @transform_1(%arg0: i32) -> (i32, i32, i32) {
    %c0_i32 = arith.constant 0 : i32
    %c0_i32_0 = arith.constant 0 : i32
    %c0_i32_1 = arith.constant 0 : i32
    return %arg0, %c0_i32, %c0_i32_0 : i32, i32, i32
  }
  func.func @transform_2(%arg0: i32) -> (i32, i32) {
    %c0_i32 = arith.constant 0 : i32
    %c0_i32_0 = arith.constant 0 : i32
    %c0_i32_1 = arith.constant 0 : i32
    return %c0_i32, %c0_i32_0 : i32, i32
  }
  func.func @transform_3(%arg0: i32) -> (i32, i32, i32) {
    %c0_i32 = arith.constant 0 : i32
    %c0_i32_0 = arith.constant 0 : i32
    %c0_i32_1 = arith.constant 0 : i32
    return %arg0, %c0_i32, %c0_i32_0 : i32, i32, i32
  }
  func.func @transform_4(%arg0: i32) -> (i32, i32, i32) {
    %c0_i32 = arith.constant 0 : i32
    %c0_i32_0 = arith.constant 0 : i32
    %c0_i32_1 = arith.constant 0 : i32
    return %arg0, %c0_i32, %c0_i32_0 : i32, i32, i32
  }
  func.func @transform_5(%arg0: i32) -> (i32, i32, i32) {
    %c0_i32 = arith.constant 0 : i32
    %c0_i32_0 = arith.constant 0 : i32
    %c0_i32_1 = arith.constant 0 : i32
    return %arg0, %c0_i32, %c0_i32_0 : i32, i32, i32
  }
  func.func @transform_6(%arg0: i32) -> (i32, i32, i32) {
    %c0_i32 = arith.constant 0 : i32
    %c0_i32_0 = arith.constant 0 : i32
    %c0_i32_1 = arith.constant 0 : i32
    return %arg0, %c0_i32, %c0_i32_0 : i32, i32, i32
  }
  func.func @transform_7(%arg0: i32) -> (i32, i32, i32) {
    %c0_i32 = arith.constant 0 : i32
    %c0_i32_0 = arith.constant 0 : i32
    %c0_i32_1 = arith.constant 0 : i32
    return %arg0, %c0_i32, %c0_i32_0 : i32, i32, i32
  }
  func.func @transform_8(%arg0: i32) -> (i32, i32, i32) {
    %c0_i32 = arith.constant 0 : i32
    %c0_i32_0 = arith.constant 0 : i32
    %c0_i32_1 = arith.constant 0 : i32
    return %arg0, %c0_i32, %c0_i32_0 : i32, i32, i32
  }
  func.func @transform_9(%arg0: i32) -> (i32, i32, i32) {
    %c0_i32 = arith.constant 0 : i32
    %c0_i32_0 = arith.constant 0 : i32
    %c0_i32_1 = arith.constant 0 : i32
    return %arg0, %c0_i32, %c0_i32_0 : i32, i32, i32
  }
  func.func @transform_10(%arg0: i32) -> (i32, i32, i32) {
    %c0_i32 = arith.constant 0 : i32
    %c0_i32_0 = arith.constant 0 : i32
    %c0_i32_1 = arith.constant 0 : i32
    return %arg0, %c0_i32, %c0_i32_0 : i32, i32, i32
  }
  func.func @transform_11(%arg0: i32) -> (i32, i32, i32) {
    %c0_i32 = arith.constant 0 : i32
    %c0_i32_0 = arith.constant 0 : i32
    %c0_i32_1 = arith.constant 0 : i32
    return %arg0, %c0_i32, %c0_i32_0 : i32, i32, i32
  }
  func.func @transform_12(%arg0: i32) -> (i32, i32, i32) {
    %c0_i32 = arith.constant 0 : i32
    %c0_i32_0 = arith.constant 0 : i32
    %c0_i32_1 = arith.constant 0 : i32
    return %arg0, %c0_i32, %c0_i32_0 : i32, i32, i32
  }
  func.func @transform_13(%arg0: i32) -> (i32, i32, i32) {
    %c0_i32 = arith.constant 0 : i32
    %c0_i32_0 = arith.constant 0 : i32
    %c0_i32_1 = arith.constant 0 : i32
    return %arg0, %c0_i32, %c0_i32_0 : i32, i32, i32
  }
}

</mosaic_0001>

<bundles_post_ra>
// kernel: tpu_custom_call.1
= control target key start
LH: loop header
LB: loop body
LE: loop exit
PB: predicated region body
PF: predicated region fallthrough
CT: control target
= control target key end

     0   :  { %s3636_s0 = inlined_call_operand.vmem [shape: f32[2,16,256], index: 0, kind: input, shape index: {}]   ;;  %s3637_s1 = inlined_call_operand.hbm [shape: f32[2,4,256], index: 1, kind: input, shape index: {}]   ;;  %s3638_s2 = inlined_call_operand.hbm [shape: f32[2,256], index: 2, kind: input, shape index: {}]   ;;  %s3639_s3 = inlined_call_operand.hbm [shape: f32[2,1,256], index: 3, kind: input, shape index: {}]   ;;  %s3640_s4 = inlined_call_operand.vmem [shape: s32[2,8,1], index: 4, kind: input, shape index: {}]   ;;  %s3641_s5 = inlined_call_operand.hbm [shape: s32[2,1,8], index: 5, kind: input, shape index: {}]   ;;  %s3642_s6 = inlined_call_operand.vmem [shape: f32[2,8,4], index: 6, kind: input, shape index: {}]   ;;  %s3643_s7 = inlined_call_operand.vmem [shape: f32[2,8,8], index: 7, kind: input, shape index: {}]   ;;  %s3644_s8 = inlined_call_operand.vmem [shape: f32[2,8,1], index: 8, kind: input, shape index: {}]   ;;  %s3645_s9 = inlined_call_operand.vmem [shape: f32[2,8,1], index: 9, kind: input, shape index: {}]   ;;  %s3646_s10 = inlined_call_operand.hbm [shape: f32[2,4,256], index: 10, kind: output, shape index: {0}]   ;;  %s3647_s11 = inlined_call_operand.hbm [shape: f32[2,16,256], index: 11, kind: output, shape index: {1}]   ;;  %s3648_s12 = inlined_call_operand.hbm [shape: f32[2,1,256], index: 12, kind: output, shape index: {2}]   ;;  %s3649_s13 = inlined_call_operand.hbm [shape: s32[2,8,256], index: 13, kind: output, shape index: {3}]  }
   0x1   :  { %3667 = sst [smem:[#allocation25_spill]] %s3637_s1 }
   0x2   :  { %3668 = sst [smem:[#allocation26_spill]] %s3639_s3 }
   0x3   :  { %3669 = sst [smem:[#allocation27_spill]] %s3643_s7 }
   0x4   :  { %3670 = sst [smem:[#allocation28_spill]] %s3646_s10 }
   0x5   :  { %3671 = sst [smem:[#allocation29_spill]] %s3647_s11 }
   0x6   :  { %3672 = sst [smem:[#allocation30_spill]] %s3648_s12 }
   0x7   :  { %3673 = sst [smem:[#allocation31_spill]] %s3649_s13 }
   0x8   :  { %19 = vsyncpa [#allocation3], 0 }
   0x9   :  { %21 = vsyncpa [#allocation3 + $0x1], 0 }
   0xa   :  { %22 = vsyncpa [#allocation6], 0 }
   0xb   :  { %23 = vsyncpa [#allocation4], 0 }
   0xc   :  { %25 = vsyncpa [#allocation4 + $0x1], 0 }
   0xd   :  { %26 = vsyncpa [#allocation11], 0 }
   0xe   :  { %28 = vsyncpa [#allocation11 + $0x1], 0 }
   0xf   :  { %29 = vsyncpa [#allocation14], 0 }
  0x10   :  { %31 = vsyncpa [#allocation14 + $0x1], 0  ;;  %s2894_s25 = smov 0   ;;  %s2896_s26 = smov 0  }
  0x11   :  { %s2898_s27 = smov 0   ;;  %s2900_s28 = smov 0  }
  0x12 LB: > { %3674 = sst [smem:[#allocation21_spill]] %s2799_s27  ;;  %s2915_s29 = sadd.s32 1, %s2803_s28   ;;  %s2803_s28 = sphi %s2900_s28, %s3707_s28   ;;  %s2799_s27 = sphi %s2898_s27, %s3709_s27   ;;  %s2795_s26 = sphi %s2896_s26, %s3711_s26   ;;  %s2791_s25 = sphi %s2894_s25, %s3710_s25  }
  0x13   : > { %3675 = sst [smem:[#allocation22_spill]] %s2803_s28  ;;  %s70_s30 = sadd.s32 1, %s2799_s27 }
  0x14   : > { %3676 = sst [smem:[#allocation23_spill]] %s2915_s29  ;;  %s67_s14 = ssub.s32 %s2803_s28, %s2915_s29 }
  0x15   : > { %p3656_p0 = scmp.ne.s32.totalorder %s2799_s27, %s2795_s26  ;;  %p68_p1 = scmp.eq.s32.totalorder %s67_s14, 0 }
  0x16   : > { %p78_p2 = scmp.eq.s32.totalorder %s2803_s28, 0  ;;  %p2463_p4 = scmp.lt.s32.totalorder %s2803_s28, 2 }
  0x17   : > { %s2926_s15 = scalar_select %p68_p1, %s2799_s27, %s70_s30  }
  0x18   : > { %p79_p5 = por %p78_p2, %p3656_p0  ;;  %s433_s16 = sand.u32 1, %s2803_s28  }
  0x19   : > { %3677 = sst [smem:[#allocation24_spill]] %s2926_s15  ;;  %s2933_s17 = sand.u32 1, %s2799_s27  }
  0x1a   : > { %s2325_s18 = sshll.u32 %s2933_s17, 3  ;;  %s2406_s19 = sshll.u32 %s2803_s28, 7 }
  0x1b   : > { %s3678_s1 = sld [smem:[#allocation25_spill]]  ;;  %s437_s23 = scalar_lea.vmem [#allocation2], %s2325_s18 }
  0x1c   : > { %s445_s24 = sshll.u32 %s437_s23, 4  ;;  %p2942_p6 = pnand %p2463_p4, %p79_p5  ;;  %s446_s24 = int_to_ptr.vmem [resolvable:$true] %s445_s24 }
  0x1d   : > { %s2328_s14 = sshll.u32 %s2933_s17, 1  ;;  %s2947_s15 = scalar_lea.sflag [#allocation3], %s433_s16 }
  0x1e   : > { %p2953_p8 = pneg %p2942_p6 }
  0x21   : > { %s2940_s22 = scalar_lea.hbm %s3678_s1, %s2406_s19  ;;  %s2540_s21 = scalar_lea.hbm %s3678_s1, 256 }
  0x22   : > { %s2535_s29 = scalar_lea.hbm %s2940_s22, 128  ;;  %p2541_p11 = scmp.lt.s32.totalorder %s2940_s22, %s3678_s1 }
  0x23   : > { %p2536_p7 = scmp.ne.s32.totalorder %s2940_s22, %s2535_s29  ;;  %p2542_p12 = scmp.lt.s32.totalorder %s2540_s21, %s2535_s29 }
  0x25   : > { %p2538_p9 = pnand %p2953_p8, %p2536_p7  ;;  %p2543_p13 = por %p2542_p12, %p2541_p11 }
  0x27   : > { %p2539_p10 = pneg %p2538_p9 }
  0x29   : > { %p2544_p1 = pnand %p2543_p13, %p2539_p10 }
  0x2b   : > { %2547 = shalt.err (!%p2544_p1)
}
  0x2c   : > { %s2548_s16 = scalar_lea.vmem %s446_s24, 128  ;;  %s2805_s11 = smov [#allocation2]  }
  0x2d   : > { %p2549_p2 = scmp.ne.s32.totalorder %s446_s24, %s2548_s16  ;;  %s2553_s13 = sshll.u32 %s2805_s11, 4  ;;  %s2554_s13 = int_to_ptr.vmem [resolvable:$false] %s2553_s13 }
  0x2e   : > { %s2555_s10 = scalar_lea.vmem %s2554_s13, 256  ;;  %p2556_p7 = scmp.lt.s32.totalorder %s446_s24, %s2554_s13 }
  0x2f   : > { %p2551_p4 = pnand %p2549_p2, %p2953_p8  ;;  %p2557_p9 = scmp.lt.s32.totalorder %s2555_s10, %s2548_s16 }
  0x31   : > { %p2552_p5 = pneg %p2551_p4  ;;  %p2558_p3 = por %p2557_p9, %p2556_p7 }
  0x33   : > { %p2559_p0 = pnand %p2558_p3, %p2552_p5 }
  0x35   : > { %2562 = shalt.err (!%p2559_p0)
}
  0x36   : > { %2442 = dma.hbm_to_vmem [thread:$0]  (!%p2942_p6), %s2940_s22, 128, %s446_s24, %s2947_s15  }
  0x37   : > { %s2407_s12 = sshll.u32 %s2803_s28, 5  ;;  %s456_s29 = scalar_lea.vmem [#allocation7], %s2328_s14 }
  0x38   : > { %s464_s18 = sshll.u32 %s456_s29, 4  ;;  %s3681_s3 = sld [smem:[#allocation26_spill]]  ;;  %s465_s18 = int_to_ptr.vmem [resolvable:$true] %s464_s18 }
  0x3e   : > { %s462_s11 = scalar_lea.hbm %s3681_s3, %s2407_s12  ;;  %s2568_s16 = scalar_lea.hbm %s3681_s3, 64 }
  0x3f   : > { %s2563_s13 = scalar_lea.hbm %s462_s11, 32  ;;  %p2569_p11 = scmp.lt.s32.totalorder %s462_s11, %s3681_s3 }
  0x40   : > { %p2564_p10 = scmp.ne.s32.totalorder %s462_s11, %s2563_s13  ;;  %p2570_p12 = scmp.lt.s32.totalorder %s2568_s16, %s2563_s13 }
  0x42   : > { %p2566_p3 = pnand %p2564_p10, %p2953_p8  ;;  %p2571_p13 = por %p2570_p12, %p2569_p11 }
  0x44   : > { %p2567_p0 = pneg %p2566_p3 }
  0x46   : > { %p2572_p1 = pnand %p2571_p13, %p2567_p0 }
  0x48   : > { %2575 = shalt.err (!%p2572_p1)
}
  0x49   : > { %s2576_s22 = scalar_lea.vmem %s465_s18, 32  ;;  %s2806_s24 = smov [#allocation7]  }
  0x4a   : > { %p2577_p2 = scmp.ne.s32.totalorder %s465_s18, %s2576_s22  ;;  %s2581_s14 = sshll.u32 %s2806_s24, 4  ;;  %s2582_s14 = int_to_ptr.vmem [resolvable:$false] %s2581_s14 }
  0x4b   : > { %s2583_s12 = scalar_lea.vmem %s2582_s14, 64  ;;  %p2584_p7 = scmp.lt.s32.totalorder %s465_s18, %s2582_s14 }
  0x4c   : > { %p2579_p4 = pnand %p2577_p2, %p2953_p8  ;;  %p2585_p9 = scmp.lt.s32.totalorder %s2583_s12, %s2576_s22 }
  0x4e   : > { %p2580_p5 = pneg %p2579_p4  ;;  %p2586_p10 = por %p2585_p9, %p2584_p7 }
  0x50   : > { %p2587_p3 = pnand %p2586_p10, %p2580_p5 }
  0x52   : > { %2590 = shalt.err (!%p2587_p3)
}
  0x53   : > { %2445 = dma.hbm_to_vmem [thread:$0]  (!%p2942_p6), %s462_s11, 32, %s465_s18, %s2947_s15  }
  0x54   : > { %s2990_s1 = sadd.s32 4294967295, %s2803_s28   ;;  %s3657_s7 = sadd.s32 4294967294, %s2803_s28  }
  0x55   : > { %p83_p0 = scmp.ne.s32.totalorder %s2795_s26, %s2791_s25  ;;  %p3658_p11 = scmp.eq.s32.totalorder %s2990_s1, 0 }
  0x56   : > { %p310_p12 = scmp.eq.s32.totalorder %s2990_s1, 1  ;;  %p316_p13 = scmp.eq.s32.totalorder %s3657_s7, 1 }
  0x57   : > { %p3001_p1 = por %p3658_p11, %p83_p0  ;;  %p2322_p2 = scmp.ge.s32.totalorder %s2803_s28, 1 }
  0x58   : > { %p3683_p4 = scmp.ne.s32.totalorder %s2799_s27, %s2795_s26  ;;  %p3013_p7 = por %p316_p13, %p83_p0 }
  0x59   : > { %s3682_s29 = scalar_select %p3001_p1, 1, 0 }
  0x5a   : > { %p3009_p5 = por %p310_p12, %p3683_p4  ;;  %p401_p9 = scmp.lt.s32.totalorder %s2803_s28, 3 }
  0x5b   : > { %s3685_s20 = scalar_select %p3013_p7, 1, 0 }
  0x5c   : > { %s3684_s18 = scalar_select %p3009_p5, 1, 0 }
  0x5d   : > { %p3018_p10 = pnand %p2322_p2, %p401_p9  ;;  %s2807_s11 = smov [#allocation5]  }
  0x5e   : > { %s414_s13 = sshll.u32 %s2807_s11, 4  ;;  %s2331_s10 = sshll.u32 %s2803_s28, 4  ;;  %s3030_s13 = int_to_ptr.vmem [resolvable:$true] %s414_s13 }
  0x5f   : > { %s3686_s21 = scalar_select %p3018_p10, 1, 0 }
  0x60   : > { %p2435_p3 = pneg %p3018_p10  ;;  %s3028_s22 = scalar_lea.hbm %s3641_s5, %s2331_s10 }
  0x61   : > { %s481_s24 = scalar_lea.vmem [#allocation8], %s2933_s17  ;;  %s2591_s11 = scalar_lea.hbm %s3028_s22, 16 }
  0x62   : > { %s488_s14 = sshll.u32 %s481_s24, 4  ;;  %p3035_p0 = pnand %p2435_p3, %p3658_p11  ;;  %s489_s14 = int_to_ptr.vmem [resolvable:$true] %s488_s14 }
  0x63   : > { %p2592_p12 = scmp.ne.s32.totalorder %s3028_s22, %s2591_s11  ;;  %s2596_s16 = scalar_lea.hbm %s3641_s5, 32 }
  0x64   : > { %s3687_s12 = scalar_select %p3035_p0, 1, 0 }
  0x65   : > { %p2594_p13 = pnand %p2592_p12, %p2953_p8  ;;  %p2597_p4 = scmp.lt.s32.totalorder %s3028_s22, %s3641_s5 }
  0x66   : > { %p2598_p9 = scmp.lt.s32.totalorder %s2596_s16, %s2591_s11 }
  0x67   : > { %p2595_p2 = pneg %p2594_p13 }
  0x68   : > { %p2599_p7 = por %p2598_p9, %p2597_p4 }
  0x6a   : > { %p2600_p3 = pnand %p2599_p7, %p2595_p2 }
  0x6c   : > { %2603 = shalt.err (!%p2600_p3)
}
  0x6d   : > { %s2604_s17 = scalar_lea.vmem %s489_s14, 16  ;;  %s2808_s24 = smov [#allocation8]  }
  0x6e   : > { %p2605_p11 = scmp.ne.s32.totalorder %s489_s14, %s2604_s17  ;;  %s2609_s27 = sshll.u32 %s2808_s24, 4  ;;  %s2610_s27 = int_to_ptr.vmem [resolvable:$false] %s2609_s27 }
  0x6f   : > { %s2611_s28 = scalar_lea.vmem %s2610_s27, 32  ;;  %p2612_p12 = scmp.lt.s32.totalorder %s489_s14, %s2610_s27 }
  0x70   : > { %p2607_p5 = pnand %p2605_p11, %p2953_p8  ;;  %p2613_p13 = scmp.lt.s32.totalorder %s2611_s28, %s2604_s17 }
  0x72   : > { %p2608_p1 = pneg %p2607_p5  ;;  %p2614_p10 = por %p2613_p13, %p2612_p12 }
  0x74   : > { %p2615_p0 = pnand %p2614_p10, %p2608_p1 }
  0x76   : > { %2618 = shalt.err (!%p2615_p0)
}
  0x77   : > { %2448 = dma.hbm_to_vmem [thread:$0]  (!%p2942_p6), %s3028_s22, 16, %s489_s14, %s2947_s15  }
  0x78   : > { %p3688_p8 = scmp.ne.s32.totalorder %s3687_s12, 0  ;;  %s2630_s3 = scalar_lea.vmem %s3030_s13, 64 }
  0x79   : > { %p2631_p5 = scmp.ne.s32.totalorder %s3030_s13, %s2630_s3  ;;  %p2638_p4 = scmp.lt.s32.totalorder %s3030_s13, %s3030_s13 }
  0x7a   : > { %p2621_p11 = pneg %p3688_p8  ;;  %p2639_p9 = scmp.lt.s32.totalorder %s2630_s3, %s2630_s3 }
  0x7c   : > { %p2633_p7 = pnand %p2631_p5, %p2621_p11  ;;  %p2640_p1 = por %p2639_p9, %p2638_p4 }
  0x7e   : > { %p2634_p2 = pneg %p2633_p7 }
  0x80   : > { %p2641_p10 = pnand %p2640_p1, %p2634_p2 }
  0x82   : > { %2644 = shalt.err (!%p2641_p10)
}
  0x83   : > { %2438 = dma.hbm_to_vmem [thread:$0]  (!%p3688_p8), %s3638_s2, 64, %s3030_s13, [#allocation6]  }
  0x84   : > { %p3689_p6 = scmp.ne.s32.totalorder %s3686_s21, 0 }
  0x85   : > { %s3666_s15 = sand.u32 (!%p3689_p6), 1, %s2990_s1   ;;  %s3072_s30 = sand.u32 (!%p3689_p6), 1, %s2795_s26  }
  0x86   : > { %525 = sbr.rel (%p3689_p6) target bundleno = 6688 (0x1a20), region = 60  ;;  %s2333_s19 = sshll.u32 (!%p3689_p6), %s3072_s30, 3 }
  0x87   : > { %s528_s7 = scalar_lea.sflag (!%p3689_p6), [#allocation3], %s3666_s15  ;;  %s3079_s22 = scalar_lea.vmem (!%p3689_p6), [#allocation2], %s2333_s19 }
  0x88   : > { %p3690_p0 = scmp.ne.s32.totalorder (!%p3689_p6), %s3682_s29, 0 }
  0x8b   : > { %2766 = dma.done.wait (%p3690_p0), %s528_s7, 128  }
  0x8c   : > { %2768 = vsyncadd (%p3690_p0), %s528_s7, 4294967168  ;;  %p3691_p3 = scmp.eq.s32.totalorder %s2990_s1, 0 }
  0x8e   : > { %2770 = dma.done.wait (%p3691_p3), [#allocation6], 64   ;;  %p3692_p12 = pmov %p3691_p3 }
  0x8f   : > { %s2335_s21 = sshll.u32 %s3072_s30, 1 }
  0x90   : > { %2772 = vsyncadd (%p3692_p12), [#allocation6], 4294967232  ;;  %s3092_s13 = scalar_lea.vmem [#allocation7], %s2335_s21 }
  0x91   : > { %2774 = dma.done.wait (%p3690_p0), %s528_s7, 48  }
  0x92   : > { %2776 = vsyncadd (%p3690_p0), %s528_s7, 4294967248  ;;  %p644_p13 = scmp.lt.s32.totalorder %s2990_s1, 1  ;;  %v2809_v0 = vmov 0   ;;  %v2810_v1 = vmov 0.0   ;;  %s2811_s7 = smov 2   ;;  %v2812_v8 = vmov 2   ;;  %v682_v10 = vlaneseq }
  0x93   : > { %2510 = vset.pattern.permute.xlu0 %v2809_v0  ;;  %758 = vmatprep.mubr.f32.mxu0 %v2810_v1  ;;  %v2813_v9 = vmov 1   ;;  %vm690_vm0 = vcmask 130048   ;;  %v2815_v17 = vmov 3   ;;  %v3126_v21 = vld [vmem:[%s3079_s22] sm:$0xff]  ;;  %s2339_s16 = sshll.u32 %s3072_s30, 4  ;;  %s3445_s3 = scalar_lea.vmem [#allocation12], %s2335_s21 }
  0x94   : > { %s645_s14 = scalar_select %p644_p13, %s2990_s1, 1  ;;  %1790 = vmatprep.mubr.f32.mxu1 %v2810_v1  ;;  %2511 = vset.pattern.permute.xlu1 %v2812_v8  ;;  %v3116_v11 = vand.u32 127, %v682_v10  ;;  %v3129_v22 = vshrl.u32 %v682_v10, 7  ;;  %v772_v23 = vrot.slane %v3126_v21, 6 }
  0x95   : > { %s3408_s17 = scalar_lea.vmem [#allocation13], %s2339_s16  ;;  %s622_s21 = scalar_lea.vmem [#allocation9], %s2333_s19 }
  0x96   : > { %s3102_s12 = sshll.u32 %s645_s14, 3  ;;  %s2408_s11 = sshll.u32 %s645_s14, 5  ;;  %v838_v24 = vsub.s32 7, %v3129_v22  ;;  %v774_v25 = vsub.f32 %v3126_v21, %v772_v23  ;;  %v3137_v26 = vsub.s32 1, %v3129_v22  ;;  %v786_v27 = vsub.s32 6, %v3129_v22 }
  0x97   : > { %s652_s29 = scalar_lea.vmem %s3640_s4, %s3102_s12  ;;  %s656_s24 = scalar_lea.vmem %s3642_s6, %s3102_s12  ;;  %v3141_v28 = vsub.s32 3, %v3129_v22  ;;  %v862_v29 = vsub.s32 5, %v3129_v22  ;;  %v3147_v31 = vsub.s32 2, %v3129_v22  ;;  %v3150_v32 = vsub.s32 0, %v3129_v22 }
  0x98   : > { %s648_s28 = scalar_lea.vmem %s3636_s0, %s2408_s11  ;;  %v676_v2 = vld [vmem:[%s652_s29] sm:$0xff]  ;;  %s2814_s14 = smov 127   ;;  %v810_v33 = vsub.s32 4, %v3129_v22  ;;  %v859_v34 = vrot.slane %v3126_v21, %v3137_v26  ;;  %v775_v36 = vadd.f32 1e-07, %v774_v25  ;;  %v839_v38 = vrot.slane %v3126_v21, %v838_v24 }
  0x99   : > { %v672_v3 = vld [vmem:[%s648_s28 + $0x18] sm:$0xff]  ;;  %685 = vperm.xlu0 %2510, %v676_v2   ;;  %v671_v4 = vld [vmem:[%s648_s28 + $0x10] sm:$0xff]  ;;  %v670_v5 = vld [vmem:[%s648_s28 + $0x8] sm:$0xff]  ;;  %s664_s23 = scalar_lea.vmem %s3644_s8, %s3102_s12  ;;  %v835_v37 = vrot.slane %v3126_v21, %v3141_v28  ;;  %v863_v39 = vrot.slane %v3126_v21, %v862_v29  ;;  %v783_v40 = vrot.slane %v3126_v21, %v3147_v31  ;;  %v787_v41 = vrot.slane %v3126_v21, %v786_v27  ;;  %s668_s29 = scalar_lea.vmem %s3645_s9, %s3102_s12 }
  0x9a   : > { %722 = vmatprep.subr.mxu0 %v672_v3  ;;  %v669_v6 = vld [vmem:[%s648_s28] sm:$0xff]  ;;  %v807_v42 = vrot.slane %v3126_v21, %v3150_v32  ;;  %v811_v43 = vrot.slane %v3126_v21, %v810_v33  ;;  %v869_v44 = vrot.slane %v859_v34, %v3137_v26  ;;  %v849_v46 = vrot.slane %v839_v38, %v3141_v28  ;;  %p3697_p11 = scmp.ne.s32.totalorder %s3684_s18, 0 }
  0x9b   : > { %v678_v7 = vld [vmem:[%s656_s24] sm:$0xff]  ;;  %723 = vmatpush1.msra.mxu0 %v671_v4  ;;  %v845_v45 = vrot.slane %v835_v37, %v3141_v28  ;;  %v873_v47 = vrot.slane %v863_v39, %v3137_v26  ;;  %v2349_v48 = vrot.slane %v775_v36, 9  ;;  %v793_v51 = vrot.slane %v783_v40, %v3147_v31  ;;  %v675_v39 = vld [vmem:[%s3092_s13] sm:$0x3]  ;;  %s552_s24 = scalar_lea.vmem [#allocation8], %s3072_s30  ;;  %s1995_s13 = sshll.u32 %s622_s21, 4  ;;  %s1996_s13 = int_to_ptr.vmem [resolvable:$true] %s1995_s13 }
  0x9c   : > { %724 = vmatprep.subr.mxu0 %v670_v5  ;;  %v680_v20 = vld [vmem:[%s664_s23] sm:$0xff]  ;;  %v797_v52 = vrot.slane %v787_v41, %v3147_v31  ;;  %v817_v53 = vrot.slane %v807_v42, %v3150_v32  ;;  %v821_v54 = vrot.slane %v811_v43, %v3150_v32  ;;  %s3696_s23 = sld [smem:[#allocation28_spill]]  ;;  %s2645_s16 = scalar_lea.vmem %s1996_s13, 128 }
  0x9d   : > { %725 = vmatpush1.msra.mxu0 %v669_v6  ;;  %766 = vrot.lane.b32.xlu0 %v678_v7, %s2811_s7  ;;  %v891_v59 = vmul.f32 %v2349_v48, %v774_v25  ;;  %v1006_v48 = vrot.slane %v675_v39, %v3150_v32  ;;  %s3695_s7 = sld [smem:[#allocation27_spill]]  ;;  %p2646_p8 = scmp.ne.s32.totalorder %s1996_s13, %s2645_s16 }
  0x9f   : > { %v901_v3 = vrot.slane %v891_v59, %v3147_v31  ;;  %v905_v4 = vrot.slane %v891_v59, %v786_v27  ;;  %p2647_p5 = pnand %p2646_p8, %p3697_p11 }
  0xa1   : > { %801 = vperm.xlu0 %2510, %v678_v7   ;;  %p2648_p7 = pneg %p2647_p5 }
  0xa5   : > { %2513 = vset.pattern.permute.xlu0 %v2813_v9  ;;  %v911_v9 = vrot.slane %v901_v3, %v3147_v31 }
  0xa6   : > { %853 = vperm.xlu0 %2513, %v678_v7  }
  0xaa   : > { %2516 = vset.pattern.permute.xlu0 %v2809_v0 }
 0x114   : > { %v686_v12 = vpop.permute.xlu0 %685 }
 0x115   : > { %vm687_vm1 = vcmp.eq.s32.totalorder %v686_v12, %v3116_v11  ;;  %v915_v12 = vrot.slane %v905_v4, %v3147_v31 }
 0x116   : > { %v2347_v13 = vsel %vm687_vm1, 1.0, %v2810_v1 }
 0x117   : > { %2348 = vmatmul.mubr.msk.f32.vlgmr.msra.gmra.mxu0 %vm690_vm0, %v2347_v13 }
 0x118   : > { %v767_v14 = vpop.permute.xlu0 %766  ;;  %1678 = vmatprep.mubr.f32.mxu0 %v2810_v1 }
 0x119   : > { %v769_v15 = vsub.f32 %v678_v7, %v767_v14 }
 0x11b   : > { %v770_v16 = vadd.f32 1e-07, %v769_v15 }
 0x11c   : > { %v3155_v35 = vpop.permute.xlu0 %801 }
 0x11d   : > { %883 = vrot.lane.b32.xlu1 %v770_v16, %s2814_s14  ;;  %v822_v62 = vmax.f32 %v3155_v35, %v817_v53  ;;  %v823_v63 = vmax.f32 %v3155_v35, %v821_v54  ;;  %v928_v42 = vmin.f32 %v3155_v35, %v817_v53  ;;  %s660_s14 = scalar_lea.vmem %s3695_s7, %s3102_s12  ;;  %s2409_s12 = sshll.u32 %s2990_s1, 7 }
 0x11e   : > { %s1993_s22 = scalar_lea.hbm %s3696_s23, %s2409_s12 }
 0x121   : > { %777 = vperm.xlu1 %2511, %v678_v7   ;;  %v3177_v50 = vpop.permute.xlu0 %853 }
 0x122   : > { %v874_v55 = vmax.f32 %v3177_v50, %v869_v44  ;;  %v875_v58 = vmax.f32 %v3177_v50, %v873_v47  ;;  %v934_v36 = vmin.f32 %v3177_v50, %v869_v44  ;;  %v935_v38 = vmin.f32 %v3177_v50, %v873_v47 }
 0x123   : > { %v946_v47 = vrot.slane %v772_v23, 4 }
 0x125   : > { %2512 = vset.pattern.permute.xlu1 %v2815_v17  ;;  %v948_v53 = vadd.f32 %v946_v47, %v3126_v21 }
 0x126   : > { %829 = vperm.xlu1 %2512, %v678_v7  }
 0x127   : > { %v957_v23 = vrot.slane %v948_v53, %v810_v33 }
 0x12a   : > { %2514 = vset.pattern.permute.xlu1 %v2812_v8 }
 0x18f   : > { %v884_v18 = vpop.permute.xlu1 %883 }
 0x190   : > { %v886_v19 = vmul.f32 %v884_v18, %v769_v15 }
 0x192   : > { %894 = vperm.xlu1 %2514, %v886_v19  }
 0x196   : > { %2515 = vset.pattern.permute.xlu1 %v2809_v0 }
 0x197   : > { %1015 = vperm.xlu1 %2515, %v680_v20  }
 0x19c   : > { %v3144_v30 = vpop.permute.xlu1 %777 }
 0x19d   : > { %v798_v60 = vmin.f32 %v3144_v30, %v793_v51  ;;  %v799_v61 = vmin.f32 %v3144_v30, %v797_v52  ;;  %v926_v40 = vmax.f32 %v3144_v30, %v793_v51  ;;  %v927_v41 = vmax.f32 %v3144_v30, %v797_v52 }
 0x19f   : > { %v824_v5 = vsub.f32 %v798_v60, %v822_v62  ;;  %v825_v6 = vsub.f32 %v799_v61, %v823_v63 }
 0x1a1   : > { %v3175_v49 = vpop.permute.xlu1 %829  ;;  %v826_v13 = vmax.f32 %v824_v5, 0.0  ;;  %v827_v14 = vmax.f32 %v825_v6, 0.0  ;;  %v953_v5 = vrot.slane %v948_v53, %v3150_v32 }
 0x1a2   : > { %v850_v56 = vmin.f32 %v3175_v49, %v845_v45  ;;  %v851_v57 = vmin.f32 %v3175_v49, %v849_v46  ;;  %v932_v34 = vmax.f32 %v3175_v49, %v845_v45  ;;  %v933_v37 = vmax.f32 %v3175_v49, %v849_v46 }
 0x1a3   : > { %v929_v45 = vmin.f32 %v3155_v35, %v821_v54  ;;  %v1010_v46 = vrot.slane %v675_v39, %v3137_v26  ;;  %v975_v54 = vrot.slane %v948_v53, %v3137_v26  ;;  %v963_v33 = vrot.slane %v953_v5, %v3150_v32 }
 0x1a4   : > { %v876_v0 = vsub.f32 %v850_v56, %v874_v55  ;;  %v877_v2 = vsub.f32 %v851_v57, %v875_v58  ;;  %v936_v43 = vsub.f32 %v932_v34, %v934_v36  ;;  %v937_v55 = vsub.f32 %v933_v37, %v935_v38 }
 0x1a5   : > { %v930_v56 = vsub.f32 %v926_v40, %v928_v42  ;;  %v931_v57 = vsub.f32 %v927_v41, %v929_v45  ;;  %v674_v41 = vld [vmem:[#allocation5] sm:$0xf] }
 0x1a6   : > { %v878_v7 = vmax.f32 %v876_v0, 0.0  ;;  %v879_v8 = vmax.f32 %v877_v2, 0.0  ;;  %v940_v51 = vmul.f32 %v936_v43, %v936_v43  ;;  %v941_v59 = vmul.f32 %v937_v55, %v937_v55 }
 0x1a7   : > { %v938_v60 = vmul.f32 %v930_v56, %v930_v56  ;;  %v939_v61 = vmul.f32 %v931_v57, %v931_v57  ;;  %v979_v2 = vrot.slane %v948_v53, %v862_v29  ;;  %v1056_v45 = vrot.slane %v674_v41, %v3150_v32 }
 0x1a8   : > { %v880_v16 = vmul.f32 %v878_v7, %v826_v13  ;;  %v881_v17 = vmul.f32 %v879_v8, %v827_v14  ;;  %v985_v8 = vrot.slane %v975_v54, %v3137_v26  ;;  %v1076_v55 = vrot.slane %v674_v41, %v3137_v26 }
 0x1a9   : > { %v942_v62 = vadd.f32 %v940_v51, %v938_v60  ;;  %v943_v0 = vadd.f32 %v941_v59, %v939_v61  ;;  %v989_v14 = vrot.slane %v979_v2, %v3137_v26  ;;  %v1060_v56 = vrot.slane %v674_v41, %v3147_v31 }
 0x1aa   : > { %v1080_v47 = vrot.slane %v674_v41, %v3141_v28  ;;  %v1066_v60 = vrot.slane %v1056_v45, %v3150_v32  ;;  %v1086_v53 = vrot.slane %v1076_v55, %v3137_v26  ;;  %v3273_v41 = vadd.s32 128, %v3116_v11 }
 0x1ab   : > { %v944_v21 = vadd.f32 1e-07, %v942_v62  ;;  %v945_v13 = vadd.f32 1e-07, %v943_v0  ;;  %v1070_v54 = vrot.slane %v1060_v56, %v3150_v32 }
 0x1ac   : > { %v1095_v31 = vsub.f32 %v3144_v30, %v1066_v60  ;;  %v1097_v28 = vsub.f32 %v3175_v49, %v1086_v53 }
 0x20d   : > { %v895_v15 = vpop.permute.xlu1 %894 }
 0x20e   : > { %v916_v18 = vadd.f32 %v911_v9, %v895_v15  ;;  %v917_v19 = vadd.f32 %v915_v12, %v895_v15 }
 0x210   : > { %v918_v20 = vsub.f32 %v916_v18, %v880_v16  ;;  %v919_v24 = vsub.f32 %v917_v19, %v881_v17 }
 0x212   : > { %v920_v25 = vadd.f32 1e-07, %v918_v20  ;;  %v921_v27 = vadd.f32 1e-07, %v919_v24  ;;  %v1016_v44 = vpop.permute.xlu1 %1015  ;;  %v967_v20 = vrot.slane %v957_v23, %v3150_v32  ;;  %v1096_v23 = vsub.f32 %v3144_v30, %v1070_v54 }
 0x213   : > { %v1018_v58 = vsub.f32 %v1006_v48, %v1016_v44  ;;  %v1019_v52 = vsub.f32 %v1010_v46, %v1016_v44 }
 0x214   : > { %2517 = vrcp.f32 %v920_v25  ;;  %v968_v25 = vsub.f32 %v963_v33, %v3155_v35  ;;  %v969_v34 = vsub.f32 %v967_v20, %v3155_v35  ;;  %v760_v20 = vpop.f32.mrf.mxu0 }
 0x215   : > { %2519 = vrcp.f32 %v921_v27  ;;  %v1020_v63 = vmul.f32 0.40528473, %v1018_v58  ;;  %v1021_v3 = vmul.f32 0.40528473, %v1019_v52 }
 0x216   : > { %2521 = vrcp.f32 %v944_v21  ;;  %v970_v37 = vsub.f32 %v968_v25, %v3144_v30  ;;  %v971_v38 = vsub.f32 %v969_v34, %v3144_v30  ;;  %v1091_v21 = vsub.f32 %v1086_v53, %v3177_v50  ;;  %v762_v25 = vpop.f32.mrf.mxu0 }
 0x217   : > { %v1022_v9 = vmul.f32 %v1020_v63, %v1018_v58  ;;  %v1023_v29 = vmul.f32 %v1021_v3, %v1019_v52  ;;  %2523 = vrcp.f32 %v945_v13  ;;  %v1090_v63 = vrot.slane %v1080_v47, %v3137_v26 }
 0x218   : > { %v994_v42 = vmul.f32 %v970_v37, %v970_v37  ;;  %v995_v43 = vmul.f32 %v971_v38, %v971_v38  ;;  %v1099_v13 = vmin.f32 %v1095_v31, %v1097_v28 }
 0x219   : > { %v1098_v5 = vsub.f32 %v3175_v49, %v1090_v63  ;;  %v1092_v32 = vsub.f32 %v1090_v63, %v3177_v50 }
 0x221   : > { %v2518_v4 = vpop.eup %2517 }
 0x222   : > { %v2520_v6 = vpop.eup %2519  ;;  %v3214_v7 = vmul.f32 %v2518_v4, %v880_v16  ;;  %v990_v16 = vsub.f32 %v985_v8, %v3177_v50 }
 0x223   : > { %v3217_v12 = vmul.f32 %v2520_v6, %v881_v17  ;;  %v991_v17 = vsub.f32 %v989_v14, %v3177_v50  ;;  %v2522_v44 = vpop.eup %2521 }
 0x224   : > { %v1024_v15 = vsub.f32 %v1022_v9, %v3214_v7  ;;  %v992_v27 = vsub.f32 %v990_v16, %v3175_v49  ;;  %v2524_v57 = vpop.eup %2523 }
 0x225   : > { %v1025_v18 = vsub.f32 %v1023_v29, %v3217_v12  ;;  %v993_v36 = vsub.f32 %v991_v17, %v3175_v49 }
 0x226   : > { %v1026_v19 = vadd.f32 1.0000001, %v1024_v15  ;;  %v996_v39 = vmul.f32 %v992_v27, %v992_v27  ;;  %v1072_v15 = vsub.f32 %v1070_v54, %v3155_v35 }
 0x227   : > { %v1027_v24 = vadd.f32 1.0000001, %v1025_v18  ;;  %v997_v40 = vmul.f32 %v993_v36, %v993_v36 }
 0x228   : > { %2525 = vrcp.f32 %v1026_v19  ;;  %v998_v48 = vadd.f32 %v996_v39, %v994_v42  ;;  %v1094_v33 = vmin.f32 %v1072_v15, %v1092_v32 }
 0x229   : > { %2527 = vrcp.f32 %v1027_v24  ;;  %v999_v46 = vadd.f32 %v997_v40, %v995_v43 }
 0x22a   : > { %v1000_v59 = vmul.f32 0.25, %v998_v48 }
 0x22b   : > { %v1001_v61 = vmul.f32 0.25, %v999_v46 }
 0x22c   : > { %v1033_v0 = vmul.f32 %v2522_v44, %v1000_v59 }
 0x22d   : > { %v1035_v3 = vmul.f32 %v2524_v57, %v1001_v61 }
 0x235   : > { %v2526_v51 = vpop.eup %2525 }
 0x236   : > { %v2528_v58 = vpop.eup %2527  ;;  %v1029_v52 = vmul.f32 %v2526_v51, %v1022_v9 }
 0x237   : > { %v1031_v62 = vmul.f32 %v2528_v58, %v1023_v29 }
 0x238   : > { %v1036_v2 = vmul.f32 %v1029_v52, %v1022_v9  ;;  %v1071_v9 = vsub.f32 %v1066_v60, %v3155_v35 }
 0x239   : > { %v1037_v4 = vmul.f32 %v1031_v62, %v1023_v29  ;;  %v1100_v29 = vmin.f32 %v1096_v23, %v1098_v5 }
 0x23a   : > { %v1038_v6 = vadd.f32 %v1036_v2, %v1033_v0  ;;  %v1093_v30 = vmin.f32 %v1071_v9, %v1091_v21 }
 0x23b   : > { %v1039_v8 = vadd.f32 %v1037_v4, %v1035_v3  ;;  %v1102_v19 = vmin.f32 %v1094_v33, %v1100_v29 }
 0x23c   : > { %v1040_v26 = vsub.f32 %v3214_v7, %v1038_v6  ;;  %v1101_v50 = vmin.f32 %v1093_v30, %v1099_v13 }
 0x23d   : > { %v1041_v14 = vsub.f32 %v3217_v12, %v1039_v8  ;;  %vm1104_vm3 = vcmp.gt.f32.partialorder %v1102_v19, 1e-09 }
 0x23e   : > { %v3250_v18 = vmax.f32 %v1040_v26, 0.0  ;;  %vm1103_vm2 = vcmp.gt.f32.partialorder %v1101_v50, 1e-09  ;;  %v3266_v37 = vsel %vm1104_vm3, 1.0, %v2810_v1 }
 0x23f   : > { %v3252_v49 = vmax.f32 %v1041_v14, 0.0  ;;  %v3263_v36 = vsel %vm1103_vm2, 1.0, %v2810_v1 }
 0x240   : > { %v1044_v16 = vmul.f32 %v3250_v18, %v3250_v18 }
 0x241   : > { %v1045_v7 = vmul.f32 %v3252_v49, %v3252_v49 }
 0x242   : > { %v1046_v17 = vmul.f32 %v1044_v16, %v1044_v16 }
 0x243   : > { %v1047_v12 = vmul.f32 %v1045_v7, %v1045_v7 }
 0x244   : > { %v1048_v24 = vmul.f32 %v1046_v17, %v1044_v16 }
 0x245   : > { %v1049_v35 = vmul.f32 %v1047_v12, %v1045_v7 }
 0x246   : > { %v3258_v27 = vmul.f32 %v1048_v24, %v760_v20 }
 0x247   : > { %v3260_v34 = vmul.f32 %v1049_v35, %v762_v25 }
 0x248   : > { %v1109_v38 = vmul.f32 %v3263_v36, %v3258_v27 }
 0x249   : > { %v1110_v39 = vmul.f32 %v3266_v37, %v3260_v34 }
 0x24b   : > { %v1114_v40 = vmax.f32 %v1109_v38, %v1110_v39 }
 0x24d   : > { %1115 = vmax.xlane.f32.xlu0 %v1114_v40 }
 0x2d6   : > { %v1116_v42 = vpop.xlane.xlu0 %1115 }
 0x2d7   : > { %vm1117_vm4 = vcmp.eq.f32.partialorder %v1109_v38, %v1116_v42  ;;  %vm1118_vm5 = vcmp.eq.f32.partialorder %v1110_v39, %v1116_v42 }
 0x2d8   : > { %v1119_v43 = vsel %vm1117_vm4, %v3116_v11, 256  ;;  %v1120_v48 = vsel %vm1118_vm5, %v3273_v41, 256 }
 0x2d9   : > { %vm1121_vm6 = vcmp.lt.s32.totalorder %v1119_v43, %v1120_v48 }
 0x2da   : > { %v1122_v45 = vsel %vm1121_vm6, %v1119_v43, %v1120_v48 }
 0x2db   : > { %v1124_v55 = vshra.s32 %v1122_v45, 16  ;;  %v1123_v46 = vand.u32 65535, %v1122_v45 }
 0x2dd   : > { %v1126_v44 = vcvt.s32.f32 %v1124_v55  ;;  %v1125_v47 = vcvt.s32.f32 %v1123_v46 }
 0x2df   : > { %1127 = vmin.xlane.f32.xlu1 %v1126_v44 }
 0x368   : > { %v1128_v56 = vpop.xlane.xlu1 %1127 }
 0x369   : > { %vm1129_vm7 = vcmp.eq.f32.partialorder %v1126_v44, %v1128_v56  ;;  %v1134_v51 = vcvt.f32.s32 %v1128_v56 }
 0x36a   : > { %v1130_v57 = vsel %vm1129_vm7, %v1125_v47, inf }
 0x36b   : > { %1131 = vmin.xlane.f32.xlu0 %v1130_v57  ;;  %v1135_v59 = vshll.u32 %v1134_v51, 16 }
 0x3f4   : > { %v1132_v58 = vpop.xlane.xlu0 %1131 }
 0x3f5   : > { %v1133_v52 = vcvt.f32.s32 %v1132_v58 }
 0x3f7   : > { %v1136_v60 = vadd.s32 %v1135_v59, %v1133_v52 }
 0x3f9   : > { %vm1137_vm8 = vcmp.eq.s32.totalorder %v3116_v11, %v1136_v60  ;;  %vm1138_vm9 = vcmp.eq.s32.totalorder %v3273_v41, %v1136_v60 }
 0x3fa   : > { %v1145_v53 = vsel %vm1137_vm8, -inf, %v1109_v38  ;;  %v1146_v61 = vsel %vm1138_vm9, -inf, %v1110_v39  ;;  %v2352_v9 = vsel %vm1137_vm8, 1.0, %v2810_v1  ;;  %v2353_v13 = vsel %vm1138_vm9, 1.0, %v2810_v1 }
 0x3fb   : > { %v1147_v62 = vmax.f32 %v1145_v53, %v1146_v61 }
 0x3fd   : > { %1148 = vmax.xlane.f32.xlu0 %v1147_v62 }
 0x486   : > { %v1149_v54 = vpop.xlane.xlu0 %1148 }
 0x487   : > { %vm1150_vm10 = vcmp.eq.f32.partialorder %v1145_v53, %v1149_v54  ;;  %vm1151_vm11 = vcmp.eq.f32.partialorder %v1146_v61, %v1149_v54 }
 0x488   : > { %v1152_v63 = vsel %vm1150_vm10, %v3116_v11, 256  ;;  %v1153_v0 = vsel %vm1151_vm11, %v3273_v41, 256 }
 0x489   : > { %vm1154_vm12 = vcmp.lt.s32.totalorder %v1152_v63, %v1153_v0 }
 0x48a   : > { %v1155_v2 = vsel %vm1154_vm12, %v1152_v63, %v1153_v0 }
 0x48b   : > { %v1157_v31 = vshra.s32 %v1155_v2, 16  ;;  %v1156_v3 = vand.u32 65535, %v1155_v2 }
 0x48d   : > { %v1159_v28 = vcvt.s32.f32 %v1157_v31  ;;  %v1158_v23 = vcvt.s32.f32 %v1156_v3 }
 0x48f   : > { %1160 = vmin.xlane.f32.xlu1 %v1159_v28 }
 0x518   : > { %v1161_v4 = vpop.xlane.xlu1 %1160 }
 0x519   : > { %vm1162_vm13 = vcmp.eq.f32.partialorder %v1159_v28, %v1161_v4  ;;  %v1167_v6 = vcvt.f32.s32 %v1161_v4 }
 0x51a   : > { %v1163_v5 = vsel %vm1162_vm13, %v1158_v23, inf }
 0x51b   : > { %1164 = vmin.xlane.f32.xlu0 %v1163_v5  ;;  %v1168_v8 = vshll.u32 %v1167_v6, 16 }
 0x5a4   : > { %v1165_v21 = vpop.xlane.xlu0 %1164 }
 0x5a5   : > { %v1166_v32 = vcvt.f32.s32 %v1165_v21 }
 0x5a7   : > { %v1169_v26 = vadd.s32 %v1168_v8, %v1166_v32 }
 0x5a9   : > { %vm1170_vm14 = vcmp.eq.s32.totalorder %v3116_v11, %v1169_v26  ;;  %vm1171_vm15 = vcmp.eq.s32.totalorder %v3273_v41, %v1169_v26 }
 0x5aa   : > { %v2354_v14 = vsel %vm1170_vm14, 1.0, %v2810_v1  ;;  %v2355_v15 = vsel %vm1171_vm15, 1.0, %v2810_v1  ;;  %v1178_v29 = vsel %vm1170_vm14, -inf, %v1145_v53  ;;  %v1179_v30 = vsel %vm1171_vm15, -inf, %v1146_v61 }
 0x5ab   : > { %v1176_v33 = vadd.f32 %v2354_v14, %v2352_v9  ;;  %v1177_v16 = vadd.f32 %v2355_v15, %v2353_v13  ;;  %v1180_v50 = vmax.f32 %v1178_v29, %v1179_v30 }
 0x5ad   : > { %1181 = vmax.xlane.f32.xlu1 %v1180_v50 }
 0x636   : > { %v1182_v7 = vpop.xlane.xlu1 %1181 }
 0x637   : > { %vm1183_vm0 = vcmp.eq.f32.partialorder %v1178_v29, %v1182_v7  ;;  %vm1184_vm1 = vcmp.eq.f32.partialorder %v1179_v30, %v1182_v7 }
 0x638   : > { %v1185_v19 = vsel %vm1183_vm0, %v3116_v11, 256  ;;  %v1186_v20 = vsel %vm1184_vm1, %v3273_v41, 256 }
 0x639   : > { %vm1187_vm2 = vcmp.lt.s32.totalorder %v1185_v19, %v1186_v20 }
 0x63a   : > { %v1188_v17 = vsel %vm1187_vm2, %v1185_v19, %v1186_v20 }
 0x63b   : > { %v1190_v12 = vshra.s32 %v1188_v17, 16  ;;  %v1189_v35 = vand.u32 65535, %v1188_v17 }
 0x63d   : > { %v1192_v24 = vcvt.s32.f32 %v1190_v12  ;;  %v1191_v38 = vcvt.s32.f32 %v1189_v35 }
 0x63f   : > { %1193 = vmin.xlane.f32.xlu0 %v1192_v24 }
 0x6c8   : > { %v1194_v25 = vpop.xlane.xlu0 %1193 }
 0x6c9   : > { %vm1195_vm3 = vcmp.eq.f32.partialorder %v1192_v24, %v1194_v25  ;;  %v1200_v40 = vcvt.f32.s32 %v1194_v25 }
 0x6ca   : > { %v1196_v39 = vsel %vm1195_vm3, %v1191_v38, inf }
 0x6cb   : > { %1197 = vmin.xlane.f32.xlu1 %v1196_v39  ;;  %v1201_v43 = vshll.u32 %v1200_v40, 16 }
 0x754   : > { %v1198_v42 = vpop.xlane.xlu1 %1197 }
 0x755   : > { %v1199_v48 = vcvt.f32.s32 %v1198_v42 }
 0x757   : > { %v1202_v45 = vadd.s32 %v1201_v43, %v1199_v48 }
 0x759   : > { %vm1203_vm4 = vcmp.eq.s32.totalorder %v3116_v11, %v1202_v45  ;;  %vm1204_vm5 = vcmp.eq.s32.totalorder %v3273_v41, %v1202_v45 }
 0x75a   : > { %v2356_v55 = vsel %vm1203_vm4, 1.0, %v2810_v1  ;;  %v2357_v44 = vsel %vm1204_vm5, 1.0, %v2810_v1  ;;  %v1211_v46 = vsel %vm1203_vm4, -inf, %v1178_v29  ;;  %v1212_v56 = vsel %vm1204_vm5, -inf, %v1179_v30 }
 0x75b   : > { %v1209_v47 = vadd.f32 %v2356_v55, %v1176_v33  ;;  %v1210_v57 = vadd.f32 %v2357_v44, %v1177_v16  ;;  %v1213_v51 = vmax.f32 %v1211_v46, %v1212_v56 }
 0x75d   : > { %1214 = vmax.xlane.f32.xlu0 %v1213_v51 }
 0x7e6   : > { %v1215_v58 = vpop.xlane.xlu0 %1214 }
 0x7e7   : > { %vm1216_vm6 = vcmp.eq.f32.partialorder %v1211_v46, %v1215_v58  ;;  %vm1217_vm7 = vcmp.eq.f32.partialorder %v1212_v56, %v1215_v58 }
 0x7e8   : > { %v1218_v59 = vsel %vm1216_vm6, %v3116_v11, 256  ;;  %v1219_v52 = vsel %vm1217_vm7, %v3273_v41, 256 }
 0x7e9   : > { %vm1220_vm8 = vcmp.lt.s32.totalorder %v1218_v59, %v1219_v52 }
 0x7ea   : > { %v1221_v60 = vsel %vm1220_vm8, %v1218_v59, %v1219_v52 }
 0x7eb   : > { %v1223_v53 = vshra.s32 %v1221_v60, 16  ;;  %v1222_v62 = vand.u32 65535, %v1221_v60 }
 0x7ed   : > { %v1225_v61 = vcvt.s32.f32 %v1223_v53  ;;  %v1224_v63 = vcvt.s32.f32 %v1222_v62 }
 0x7ef   : > { %1226 = vmin.xlane.f32.xlu1 %v1225_v61 }
 0x878   : > { %v1227_v54 = vpop.xlane.xlu1 %1226 }
 0x879   : > { %vm1228_vm9 = vcmp.eq.f32.partialorder %v1225_v61, %v1227_v54  ;;  %v1233_v2 = vcvt.f32.s32 %v1227_v54 }
 0x87a   : > { %v1229_v0 = vsel %vm1228_vm9, %v1224_v63, inf }
 0x87b   : > { %1230 = vmin.xlane.f32.xlu0 %v1229_v0  ;;  %v1234_v28 = vshll.u32 %v1233_v2, 16 }
 0x904   : > { %v1231_v31 = vpop.xlane.xlu0 %1230 }
 0x905   : > { %v1232_v3 = vcvt.f32.s32 %v1231_v31 }
 0x907   : > { %v1235_v4 = vadd.s32 %v1234_v28, %v1232_v3 }
 0x909   : > { %vm1236_vm10 = vcmp.eq.s32.totalorder %v3116_v11, %v1235_v4  ;;  %vm1237_vm11 = vcmp.eq.s32.totalorder %v3273_v41, %v1235_v4 }
 0x90a   : > { %v2358_v23 = vsel %vm1236_vm10, 1.0, %v2810_v1  ;;  %v2359_v5 = vsel %vm1237_vm11, 1.0, %v2810_v1  ;;  %v1244_v6 = vsel %vm1236_vm10, -inf, %v1211_v46  ;;  %v1245_v21 = vsel %vm1237_vm11, -inf, %v1212_v56 }
 0x90b   : > { %v1242_v8 = vadd.f32 %v2358_v23, %v1209_v47  ;;  %v1243_v32 = vadd.f32 %v2359_v5, %v1210_v57  ;;  %v1246_v26 = vmax.f32 %v1244_v6, %v1245_v21 }
 0x90d   : > { %1247 = vmax.xlane.f32.xlu1 %v1246_v26 }
 0x996   : > { %v1248_v9 = vpop.xlane.xlu1 %1247 }
 0x997   : > { %vm1249_vm12 = vcmp.eq.f32.partialorder %v1244_v6, %v1248_v9  ;;  %vm1250_vm13 = vcmp.eq.f32.partialorder %v1245_v21, %v1248_v9 }
 0x998   : > { %v1251_v13 = vsel %vm1249_vm12, %v3116_v11, 256  ;;  %v1252_v14 = vsel %vm1250_vm13, %v3273_v41, 256 }
 0x999   : > { %vm1253_vm14 = vcmp.lt.s32.totalorder %v1251_v13, %v1252_v14 }
 0x99a   : > { %v1254_v15 = vsel %vm1253_vm14, %v1251_v13, %v1252_v14 }
 0x99b   : > { %v1256_v29 = vshra.s32 %v1254_v15, 16  ;;  %v1255_v33 = vand.u32 65535, %v1254_v15 }
 0x99d   : > { %v1258_v30 = vcvt.s32.f32 %v1256_v29  ;;  %v1257_v50 = vcvt.s32.f32 %v1255_v33 }
 0x99f   : > { %1259 = vmin.xlane.f32.xlu0 %v1258_v30 }
 0xa28   : > { %v1260_v16 = vpop.xlane.xlu0 %1259 }
 0xa29   : > { %vm1261_vm15 = vcmp.eq.f32.partialorder %v1258_v30, %v1260_v16  ;;  %v1266_v19 = vcvt.f32.s32 %v1260_v16 }
 0xa2a   : > { %v1262_v7 = vsel %vm1261_vm15, %v1257_v50, inf }
 0xa2b   : > { %1263 = vmin.xlane.f32.xlu1 %v1262_v7  ;;  %v1267_v17 = vshll.u32 %v1266_v19, 16 }
 0xab4   : > { %v1264_v20 = vpop.xlane.xlu1 %1263 }
 0xab5   : > { %v1265_v12 = vcvt.f32.s32 %v1264_v20 }
 0xab7   : > { %v1268_v24 = vadd.s32 %v1267_v17, %v1265_v12 }
 0xab9   : > { %vm1269_vm0 = vcmp.eq.s32.totalorder %v3116_v11, %v1268_v24  ;;  %vm1270_vm1 = vcmp.eq.s32.totalorder %v3273_v41, %v1268_v24 }
 0xaba   : > { %v2360_v35 = vsel %vm1269_vm0, 1.0, %v2810_v1  ;;  %v2361_v25 = vsel %vm1270_vm1, 1.0, %v2810_v1  ;;  %v1277_v38 = vsel %vm1269_vm0, -inf, %v1244_v6  ;;  %v1278_v39 = vsel %vm1270_vm1, -inf, %v1245_v21 }
 0xabb   : > { %v1275_v40 = vadd.f32 %v2360_v35, %v1242_v8  ;;  %v1276_v42 = vadd.f32 %v2361_v25, %v1243_v32  ;;  %v1279_v43 = vmax.f32 %v1277_v38, %v1278_v39 }
 0xabd   : > { %1280 = vmax.xlane.f32.xlu0 %v1279_v43 }
 0xb46   : > { %v1281_v48 = vpop.xlane.xlu0 %1280 }
 0xb47   : > { %vm1282_vm2 = vcmp.eq.f32.partialorder %v1277_v38, %v1281_v48  ;;  %vm1283_vm3 = vcmp.eq.f32.partialorder %v1278_v39, %v1281_v48 }
 0xb48   : > { %v1284_v45 = vsel %vm1282_vm2, %v3116_v11, 256  ;;  %v1285_v55 = vsel %vm1283_vm3, %v3273_v41, 256 }
 0xb49   : > { %vm1286_vm4 = vcmp.lt.s32.totalorder %v1284_v45, %v1285_v55 }
 0xb4a   : > { %v1287_v44 = vsel %vm1286_vm4, %v1284_v45, %v1285_v55 }
 0xb4b   : > { %v1289_v46 = vshra.s32 %v1287_v44, 16  ;;  %v1288_v47 = vand.u32 65535, %v1287_v44 }
 0xb4d   : > { %v1291_v56 = vcvt.s32.f32 %v1289_v46  ;;  %v1290_v51 = vcvt.s32.f32 %v1288_v47 }
 0xb4f   : > { %1292 = vmin.xlane.f32.xlu1 %v1291_v56 }
 0xbd8   : > { %v1293_v57 = vpop.xlane.xlu1 %1292 }
 0xbd9   : > { %vm1294_vm5 = vcmp.eq.f32.partialorder %v1291_v56, %v1293_v57  ;;  %v1299_v59 = vcvt.f32.s32 %v1293_v57 }
 0xbda   : > { %v1295_v58 = vsel %vm1294_vm5, %v1290_v51, inf }
 0xbdb   : > { %1296 = vmin.xlane.f32.xlu0 %v1295_v58  ;;  %v1300_v60 = vshll.u32 %v1299_v59, 16 }
 0xc64   : > { %v1297_v52 = vpop.xlane.xlu0 %1296 }
 0xc65   : > { %v1298_v53 = vcvt.f32.s32 %v1297_v52 }
 0xc67   : > { %v1301_v61 = vadd.s32 %v1300_v60, %v1298_v53 }
 0xc69   : > { %vm1302_vm6 = vcmp.eq.s32.totalorder %v3116_v11, %v1301_v61  ;;  %vm1303_vm7 = vcmp.eq.s32.totalorder %v3273_v41, %v1301_v61 }
 0xc6a   : > { %v2362_v62 = vsel %vm1302_vm6, 1.0, %v2810_v1  ;;  %v2363_v54 = vsel %vm1303_vm7, 1.0, %v2810_v1  ;;  %v1310_v63 = vsel %vm1302_vm6, -inf, %v1277_v38  ;;  %v1311_v0 = vsel %vm1303_vm7, -inf, %v1278_v39 }
 0xc6b   : > { %v1308_v2 = vadd.f32 %v2362_v62, %v1275_v40  ;;  %v1309_v31 = vadd.f32 %v2363_v54, %v1276_v42  ;;  %v1312_v28 = vmax.f32 %v1310_v63, %v1311_v0 }
 0xc6d   : > { %1313 = vmax.xlane.f32.xlu1 %v1312_v28 }
 0xcf6   : > { %v1314_v3 = vpop.xlane.xlu1 %1313 }
 0xcf7   : > { %vm1315_vm8 = vcmp.eq.f32.partialorder %v1310_v63, %v1314_v3  ;;  %vm1316_vm9 = vcmp.eq.f32.partialorder %v1311_v0, %v1314_v3 }
 0xcf8   : > { %v1317_v4 = vsel %vm1315_vm8, %v3116_v11, 256  ;;  %v1318_v23 = vsel %vm1316_vm9, %v3273_v41, 256 }
 0xcf9   : > { %vm1319_vm10 = vcmp.lt.s32.totalorder %v1317_v4, %v1318_v23 }
 0xcfa   : > { %v1320_v5 = vsel %vm1319_vm10, %v1317_v4, %v1318_v23 }
 0xcfb   : > { %v1322_v6 = vshra.s32 %v1320_v5, 16  ;;  %v1321_v8 = vand.u32 65535, %v1320_v5 }
 0xcfd   : > { %v1324_v21 = vcvt.s32.f32 %v1322_v6  ;;  %v1323_v26 = vcvt.s32.f32 %v1321_v8 }
 0xcff   : > { %1325 = vmin.xlane.f32.xlu0 %v1324_v21 }
 0xd88   : > { %v1326_v32 = vpop.xlane.xlu0 %1325 }
 0xd89   : > { %vm1327_vm11 = vcmp.eq.f32.partialorder %v1324_v21, %v1326_v32  ;;  %v1332_v13 = vcvt.f32.s32 %v1326_v32 }
 0xd8a   : > { %v1328_v9 = vsel %vm1327_vm11, %v1323_v26, inf }
 0xd8b   : > { %1329 = vmin.xlane.f32.xlu1 %v1328_v9  ;;  %v1333_v15 = vshll.u32 %v1332_v13, 16 }
 0xe14   : > { %v1330_v14 = vpop.xlane.xlu1 %1329 }
 0xe15   : > { %v1331_v29 = vcvt.f32.s32 %v1330_v14 }
 0xe17   : > { %v1334_v30 = vadd.s32 %v1333_v15, %v1331_v29 }
 0xe19   : > { %vm1335_vm12 = vcmp.eq.s32.totalorder %v3116_v11, %v1334_v30  ;;  %vm1336_vm13 = vcmp.eq.s32.totalorder %v3273_v41, %v1334_v30 }
 0xe1a   : > { %v2364_v33 = vsel %vm1335_vm12, 1.0, %v2810_v1  ;;  %v2365_v16 = vsel %vm1336_vm13, 1.0, %v2810_v1  ;;  %v1343_v50 = vsel %vm1335_vm12, -inf, %v1310_v63  ;;  %v1344_v7 = vsel %vm1336_vm13, -inf, %v1311_v0 }
 0xe1b   : > { %v1341_v19 = vadd.f32 %v2364_v33, %v1308_v2  ;;  %v1342_v20 = vadd.f32 %v2365_v16, %v1309_v31  ;;  %v1345_v17 = vmax.f32 %v1343_v50, %v1344_v7 }
 0xe1d   : > { %1346 = vmax.xlane.f32.xlu0 %v1345_v17 }
 0xea6   : > { %v1347_v12 = vpop.xlane.xlu0 %1346 }
 0xea7   : > { %vm1348_vm14 = vcmp.eq.f32.partialorder %v1343_v50, %v1347_v12  ;;  %vm1349_vm15 = vcmp.eq.f32.partialorder %v1344_v7, %v1347_v12 }
 0xea8   : > { %v1350_v24 = vsel %vm1348_vm14, %v3116_v11, 256  ;;  %v1351_v35 = vsel %vm1349_vm15, %v3273_v41, 256 }
 0xea9   : > { %vm1352_vm0 = vcmp.lt.s32.totalorder %v1350_v24, %v1351_v35 }
 0xeaa   : > { %v1353_v25 = vsel %vm1352_vm0, %v1350_v24, %v1351_v35 }
 0xeab   : > { %v1355_v38 = vshra.s32 %v1353_v25, 16  ;;  %v1354_v40 = vand.u32 65535, %v1353_v25 }
 0xead   : > { %v1357_v39 = vcvt.s32.f32 %v1355_v38  ;;  %v1356_v43 = vcvt.s32.f32 %v1354_v40 }
 0xeaf   : > { %1358 = vmin.xlane.f32.xlu1 %v1357_v39 }
 0xf38   : > { %v1359_v42 = vpop.xlane.xlu1 %1358 }
 0xf39   : > { %vm1360_vm1 = vcmp.eq.f32.partialorder %v1357_v39, %v1359_v42  ;;  %v1365_v45 = vcvt.f32.s32 %v1359_v42 }
 0xf3a   : > { %v1361_v48 = vsel %vm1360_vm1, %v1356_v43, inf }
 0xf3b   : > { %1362 = vmin.xlane.f32.xlu0 %v1361_v48  ;;  %v1366_v44 = vshll.u32 %v1365_v45, 16 }
 0xfc4   : > { %v1363_v55 = vpop.xlane.xlu0 %1362 }
 0xfc5   : > { %v1364_v46 = vcvt.f32.s32 %v1363_v55 }
 0xfc7   : > { %v1367_v56 = vadd.s32 %v1366_v44, %v1364_v46 }
 0xfc9   : > { %vm1368_vm2 = vcmp.eq.s32.totalorder %v3116_v11, %v1367_v56  ;;  %vm1369_vm3 = vcmp.eq.s32.totalorder %v3273_v41, %v1367_v56 }
 0xfca   : > { %v2366_v47 = vsel %vm1368_vm2, 1.0, %v2810_v1  ;;  %v2367_v57 = vsel %vm1369_vm3, 1.0, %v2810_v1  ;;  %v1376_v51 = vsel %vm1368_vm2, -inf, %v1343_v50  ;;  %v1377_v58 = vsel %vm1369_vm3, -inf, %v1344_v7 }
 0xfcb   : > { %v1374_v59 = vadd.f32 %v2366_v47, %v1341_v19  ;;  %v1375_v52 = vadd.f32 %v2367_v57, %v1342_v20  ;;  %v1378_v60 = vmax.f32 %v1376_v51, %v1377_v58 }
 0xfcd   : > { %1379 = vmax.xlane.f32.xlu1 %v1378_v60 }
0x1056   : > { %v1380_v53 = vpop.xlane.xlu1 %1379 }
0x1057   : > { %vm1381_vm4 = vcmp.eq.f32.partialorder %v1376_v51, %v1380_v53  ;;  %vm1382_vm5 = vcmp.eq.f32.partialorder %v1377_v58, %v1380_v53 }
0x1058   : > { %v1383_v61 = vsel %vm1381_vm4, %v3116_v11, 256  ;;  %v1384_v62 = vsel %vm1382_vm5, %v3273_v41, 256 }
0x1059   : > { %vm1385_vm6 = vcmp.lt.s32.totalorder %v1383_v61, %v1384_v62 }
0x105a   : > { %v1386_v54 = vsel %vm1385_vm6, %v1383_v61, %v1384_v62 }
0x105b   : > { %v1388_v63 = vshra.s32 %v1386_v54, 16  ;;  %v1387_v2 = vand.u32 65535, %v1386_v54 }
0x105d   : > { %v1390_v0 = vcvt.s32.f32 %v1388_v63  ;;  %v1389_v28 = vcvt.s32.f32 %v1387_v2 }
0x105f   : > { %1391 = vmin.xlane.f32.xlu0 %v1390_v0 }
0x10e8   : > { %v1392_v31 = vpop.xlane.xlu0 %1391 }
0x10e9   : > { %vm1393_vm7 = vcmp.eq.f32.partialorder %v1390_v0, %v1392_v31  ;;  %v1398_v4 = vcvt.f32.s32 %v1392_v31 }
0x10ea   : > { %v1394_v3 = vsel %vm1393_vm7, %v1389_v28, inf }
0x10eb   : > { %1395 = vmin.xlane.f32.xlu1 %v1394_v3  ;;  %v1399_v5 = vshll.u32 %v1398_v4, 16 }
0x1174   : > { %v1396_v23 = vpop.xlane.xlu1 %1395 }
0x1175   : > { %v1397_v6 = vcvt.f32.s32 %v1396_v23 }
0x1177   : > { %v1400_v21 = vadd.s32 %v1399_v5, %v1397_v6 }
0x1179   : > { %vm1401_vm8 = vcmp.eq.s32.totalorder %v3116_v11, %v1400_v21  ;;  %vm1402_vm9 = vcmp.eq.s32.totalorder %v3273_v41, %v1400_v21 }
0x117a   : > { %v2368_v8 = vsel %vm1401_vm8, 1.0, %v2810_v1  ;;  %v2369_v32 = vsel %vm1402_vm9, 1.0, %v2810_v1  ;;  %v1409_v26 = vsel %vm1401_vm8, -inf, %v1376_v51  ;;  %v1410_v9 = vsel %vm1402_vm9, -inf, %v1377_v58 }
0x117b   : > { %v1407_v13 = vadd.f32 %v2368_v8, %v1374_v59  ;;  %v1408_v14 = vadd.f32 %v2369_v32, %v1375_v52  ;;  %v1411_v15 = vmax.f32 %v1409_v26, %v1410_v9 }
0x117d   : > { %1412 = vmax.xlane.f32.xlu0 %v1411_v15 }
0x1206   : > { %v1413_v29 = vpop.xlane.xlu0 %1412 }
0x1207   : > { %vm1414_vm10 = vcmp.eq.f32.partialorder %v1409_v26, %v1413_v29  ;;  %vm1415_vm11 = vcmp.eq.f32.partialorder %v1410_v9, %v1413_v29 }
0x1208   : > { %v1416_v30 = vsel %vm1414_vm10, %v3116_v11, 256  ;;  %v1417_v33 = vsel %vm1415_vm11, %v3273_v41, 256 }
0x1209   : > { %vm1418_vm12 = vcmp.lt.s32.totalorder %v1416_v30, %v1417_v33 }
0x120a   : > { %v1419_v16 = vsel %vm1418_vm12, %v1416_v30, %v1417_v33 }
0x120b   : > { %v1421_v50 = vshra.s32 %v1419_v16, 16  ;;  %v1420_v19 = vand.u32 65535, %v1419_v16 }
0x120d   : > { %v1423_v7 = vcvt.s32.f32 %v1421_v50  ;;  %v1422_v17 = vcvt.s32.f32 %v1420_v19 }
0x120f   : > { %1424 = vmin.xlane.f32.xlu1 %v1423_v7 }
0x1298   : > { %v1425_v20 = vpop.xlane.xlu1 %1424 }
0x1299   : > { %vm1426_vm13 = vcmp.eq.f32.partialorder %v1423_v7, %v1425_v20  ;;  %v1431_v24 = vcvt.f32.s32 %v1425_v20 }
0x129a   : > { %v1427_v12 = vsel %vm1426_vm13, %v1422_v17, inf }
0x129b   : > { %1428 = vmin.xlane.f32.xlu0 %v1427_v12  ;;  %v1432_v25 = vshll.u32 %v1431_v24, 16 }
0x1324   : > { %v1429_v35 = vpop.xlane.xlu0 %1428 }
0x1325   : > { %v1430_v38 = vcvt.f32.s32 %v1429_v35 }
0x1327   : > { %v1433_v39 = vadd.s32 %v1432_v25, %v1430_v38 }
0x1329   : > { %vm1434_vm14 = vcmp.eq.s32.totalorder %v3116_v11, %v1433_v39  ;;  %vm1435_vm15 = vcmp.eq.s32.totalorder %v3273_v41, %v1433_v39 }
0x132a   : > { %v2370_v40 = vsel %vm1434_vm14, 1.0, %v2810_v1  ;;  %v2371_v42 = vsel %vm1435_vm15, 1.0, %v2810_v1  ;;  %v1442_v43 = vsel %vm1434_vm14, -inf, %v1409_v26  ;;  %v1443_v48 = vsel %vm1435_vm15, -inf, %v1410_v9 }
0x132b   : > { %v1440_v45 = vadd.f32 %v2370_v40, %v1407_v13  ;;  %v1441_v55 = vadd.f32 %v2371_v42, %v1408_v14  ;;  %v1444_v44 = vmax.f32 %v1442_v43, %v1443_v48 }
0x132d   : > { %1445 = vmax.xlane.f32.xlu1 %v1444_v44 }
0x13b6   : > { %v1446_v46 = vpop.xlane.xlu1 %1445 }
0x13b7   : > { %vm1447_vm0 = vcmp.eq.f32.partialorder %v1442_v43, %v1446_v46  ;;  %vm1448_vm1 = vcmp.eq.f32.partialorder %v1443_v48, %v1446_v46 }
0x13b8   : > { %v1449_v56 = vsel %vm1447_vm0, %v3116_v11, 256  ;;  %v1450_v47 = vsel %vm1448_vm1, %v3273_v41, 256 }
0x13b9   : > { %vm1451_vm2 = vcmp.lt.s32.totalorder %v1449_v56, %v1450_v47 }
0x13ba   : > { %v1452_v57 = vsel %vm1451_vm2, %v1449_v56, %v1450_v47  ;;  %v1556_v47 = vrot.slane %v3252_v49, 4 }
0x13bb   : > { %v1454_v51 = vshra.s32 %v1452_v57, 16  ;;  %v1453_v59 = vand.u32 65535, %v1452_v57  ;;  %v1550_v57 = vrot.slane %v3250_v18, 4 }
0x13bd   : > { %v1456_v58 = vcvt.s32.f32 %v1454_v51  ;;  %v1455_v60 = vcvt.s32.f32 %v1453_v59  ;;  %v1557_v51 = vmax.f32 %v3252_v49, %v1556_v47 }
0x13bf   : > { %1457 = vmin.xlane.f32.xlu0 %v1456_v58  ;;  %v1558_v59 = vrot.slane %v1557_v51, 2 }
0x1448   : > { %v1458_v52 = vpop.xlane.xlu0 %1457 }
0x1449   : > { %vm1459_vm3 = vcmp.eq.f32.partialorder %v1456_v58, %v1458_v52  ;;  %v1464_v61 = vcvt.f32.s32 %v1458_v52  ;;  %v1551_v58 = vmax.f32 %v3250_v18, %v1550_v57 }
0x144a   : > { %v1460_v53 = vsel %vm1459_vm3, %v1455_v60, inf }
0x144b   : > { %1461 = vmin.xlane.f32.xlu1 %v1460_v53  ;;  %v1465_v54 = vshll.u32 %v1464_v61, 16  ;;  %v1552_v52 = vrot.slane %v1551_v58, 2  ;;  %v1559_v53 = vmax.f32 %v1557_v51, %v1558_v59 }
0x144d   : > { %v1553_v61 = vmax.f32 %v1551_v58, %v1552_v52 }
0x14d4   : > { %v1462_v62 = vpop.xlane.xlu1 %1461 }
0x14d5   : > { %v1463_v63 = vcvt.f32.s32 %v1462_v62 }
0x14d7   : > { %v1466_v0 = vadd.s32 %v1465_v54, %v1463_v63 }
0x14d9   : > { %vm1467_vm4 = vcmp.eq.s32.totalorder %v3116_v11, %v1466_v0  ;;  %vm1468_vm5 = vcmp.eq.s32.totalorder %v3273_v41, %v1466_v0  ;;  %v1560_v0 = vrot.slane %v1559_v53, 1 }
0x14da   : > { %v2372_v2 = vsel %vm1467_vm4, 1.0, %v2810_v1  ;;  %v2373_v31 = vsel %vm1468_vm5, 1.0, %v2810_v1  ;;  %v1475_v28 = vsel %vm1467_vm4, -inf, %v1442_v43  ;;  %v1476_v3 = vsel %vm1468_vm5, -inf, %v1443_v48 }
0x14db   : > { %v1473_v4 = vadd.f32 %v2372_v2, %v1440_v45  ;;  %v1474_v23 = vadd.f32 %v2373_v31, %v1441_v55  ;;  %v1477_v5 = vmax.f32 %v1475_v28, %v1476_v3  ;;  %v681_v45 = vld [vmem:[%s668_s29] sm:$0xff]  ;;  %v1554_v2 = vrot.slane %v1553_v61, 1  ;;  %s1966_s29 = scalar_lea.sflag [#allocation4], %s3072_s30 }
0x14dd   : > { %1478 = vmax.xlane.f32.xlu0 %v1477_v5 }
0x1566   : > { %v1479_v6 = vpop.xlane.xlu0 %1478 }
0x1567   : > { %vm1480_vm6 = vcmp.eq.f32.partialorder %v1475_v28, %v1479_v6  ;;  %vm1481_vm7 = vcmp.eq.f32.partialorder %v1476_v3, %v1479_v6 }
0x1568   : > { %v1482_v21 = vsel %vm1480_vm6, %v3116_v11, 256  ;;  %v1483_v8 = vsel %vm1481_vm7, %v3273_v41, 256  ;;  %vm1702_vm6 = vcmp.eq.s32.totalorder %v3129_v22, 0  ;;  %vm3422_vm7 = vcmp.lt.s32.totalorder %v682_v10, 256 }
0x1569   : > { %vm1484_vm8 = vcmp.lt.s32.totalorder %v1482_v21, %v1483_v8 }
0x156a   : > { %v1485_v32 = vsel %vm1484_vm8, %v1482_v21, %v1483_v8 }
0x156b   : > { %v1487_v26 = vshra.s32 %v1485_v32, 16  ;;  %v1486_v13 = vand.u32 65535, %v1485_v32 }
0x156d   : > { %v1489_v9 = vcvt.s32.f32 %v1487_v26  ;;  %v1488_v15 = vcvt.s32.f32 %v1486_v13 }
0x156f   : > { %1490 = vmin.xlane.f32.xlu1 %v1489_v9 }
0x15f8   : > { %v1491_v14 = vpop.xlane.xlu1 %1490 }
0x15f9   : > { %vm1492_vm9 = vcmp.eq.f32.partialorder %v1489_v9, %v1491_v14  ;;  %v1497_v30 = vcvt.f32.s32 %v1491_v14 }
0x15fa   : > { %v1493_v29 = vsel %vm1492_vm9, %v1488_v15, inf }
0x15fb   : > { %1494 = vmin.xlane.f32.xlu0 %v1493_v29  ;;  %v1498_v16 = vshll.u32 %v1497_v30, 16 }
0x1684   : > { %v1495_v33 = vpop.xlane.xlu0 %1494 }
0x1685   : > { %v1496_v50 = vcvt.f32.s32 %v1495_v33 }
0x1687   : > { %v1499_v7 = vadd.s32 %v1498_v16, %v1496_v50 }
0x1689   : > { %vm1500_vm10 = vcmp.eq.s32.totalorder %v3116_v11, %v1499_v7  ;;  %vm1501_vm11 = vcmp.eq.s32.totalorder %v3273_v41, %v1499_v7 }
0x168a   : > { %v2375_v19 = vsel %vm1501_vm11, 1.0, %v2810_v1  ;;  %v1508_v20 = vsel %vm1500_vm10, -inf, %v1475_v28  ;;  %v1509_v17 = vsel %vm1501_vm11, -inf, %v1476_v3  ;;  %v2374_v12 = vsel %vm1500_vm10, 1.0, %v2810_v1 }
0x168b   : > { %v1507_v24 = vadd.f32 %v2375_v19, %v1474_v23  ;;  %v1510_v35 = vmax.f32 %v1508_v20, %v1509_v17  ;;  %v1506_v25 = vadd.f32 %v2374_v12, %v1473_v4  ;;  %v1561_v28 = vmax.f32 %v1559_v53, %v1560_v0 }
0x168c   : > { %v1555_v3 = vmax.f32 %v1553_v61, %v1554_v2  ;;  %vm1610_vm11 = vcmask 64512  }
0x168d   : > { %1511 = vmax.xlane.f32.xlu1 %v1510_v35  ;;  %vm1563_vm2 = vcmp.eq.f32.partialorder %v3252_v49, %v1561_v28 }
0x168e   : > { %vm1562_vm3 = vcmp.eq.f32.partialorder %v3250_v18, %v1555_v3  ;;  %v2379_v26 = vsel %vm1563_vm2, 1.0, %v2810_v1 }
0x168f   : > { %v2378_v9 = vsel %vm1562_vm3, 1.0, %v2810_v1 }
0x1716   : > { %v1512_v38 = vpop.xlane.xlu1 %1511 }
0x1717   : > { %vm1513_vm12 = vcmp.eq.f32.partialorder %v1508_v20, %v1512_v38  ;;  %vm1514_vm13 = vcmp.eq.f32.partialorder %v1509_v17, %v1512_v38 }
0x1718   : > { %v1515_v39 = vsel %vm1513_vm12, %v3116_v11, 256  ;;  %v1516_v40 = vsel %vm1514_vm13, %v3273_v41, 256 }
0x1719   : > { %vm1517_vm14 = vcmp.lt.s32.totalorder %v1515_v39, %v1516_v40 }
0x171a   : > { %v1518_v42 = vsel %vm1517_vm14, %v1515_v39, %v1516_v40 }
0x171b   : > { %v1520_v43 = vshra.s32 %v1518_v42, 16  ;;  %v1519_v55 = vand.u32 65535, %v1518_v42 }
0x171d   : > { %v1522_v48 = vcvt.s32.f32 %v1520_v43  ;;  %v1521_v46 = vcvt.s32.f32 %v1519_v55 }
0x171f   : > { %1523 = vmin.xlane.f32.xlu0 %v1522_v48 }
0x1735   : > { %1545 = vperm.xlu0 %2516, %v681_v45  }
0x17a8   : > { %v1524_v44 = vpop.xlane.xlu0 %1523 }
0x17a9   : > { %vm1525_vm15 = vcmp.eq.f32.partialorder %v1522_v48, %v1524_v44  ;;  %v1530_v60 = vcvt.f32.s32 %v1524_v44 }
0x17aa   : > { %v1526_v56 = vsel %vm1525_vm15, %v1521_v46, inf }
0x17ab   : > { %1527 = vmin.xlane.f32.xlu1 %v1526_v56  ;;  %v1531_v54 = vshll.u32 %v1530_v60, 16 }
0x17b0   : > { %v1546_v21 = vpop.permute.xlu0 %1545 }
0x1834   : > { %v1528_v62 = vpop.xlane.xlu1 %1527 }
0x1835   : > { %v1529_v63 = vcvt.f32.s32 %v1528_v62 }
0x1837   : > { %v1532_v31 = vadd.s32 %v1531_v54, %v1529_v63  ;;  %v2385_v54 = vld [vmem:[%s552_s24] ss:$0 sm:$0xff]  ;;  %s2818_s24 = smov [#allocation9]  }
0x1838   : > { %vm1714_vm9 = vcmp.eq.s32.totalorder %v2385_v54, %v3129_v22  ;;  %s2649_s27 = sshll.u32 %s2818_s24, 4  ;;  %s2650_s27 = int_to_ptr.vmem [resolvable:$false] %s2649_s27 }
0x1839   : > { %vm1533_vm0 = vcmp.eq.s32.totalorder %v3116_v11, %v1532_v31  ;;  %vm1534_vm1 = vcmp.eq.s32.totalorder %v3273_v41, %v1532_v31  ;;  %s2651_s28 = scalar_lea.vmem %s2650_s27, 256  ;;  %p2652_p2 = scmp.lt.s32.totalorder %s1996_s13, %s2650_s27 }
0x183a   : > { %v2376_v4 = vsel %vm1533_vm0, 1.0, %v2810_v1  ;;  %v2377_v23 = vsel %vm1534_vm1, 1.0, %v2810_v1  ;;  %p2653_p4 = scmp.lt.s32.totalorder %s2651_s28, %s2645_s16 }
0x183b   : > { %v1539_v5 = vadd.f32 %v2376_v4, %v1506_v25  ;;  %v1540_v6 = vadd.f32 %v2377_v23, %v1507_v24  ;;  %v2816_v25 = vmov 1966171168  }
0x183c   : > { %v1944_v38 = vunpack.c.l.s4 %v2816_v25  ;;  %p2654_p9 = por %p2653_p4, %p2652_p2 }
0x183d   : > { %v1541_v8 = vmul.f32 %v3263_v36, %v1539_v5  ;;  %v1542_v32 = vmul.f32 %v3266_v37, %v1540_v6  ;;  %v3428_v5 = vadd.s32 8, %v3129_v22 }
0x183e   : > { %v1945_v51 = vunpack.c.0.s8 %v1944_v38  ;;  %p2655_p1 = pnand %p2654_p9, %p2648_p7 }
0x183f   : > { %v3373_v11 = vmul.f32 %v1546_v21, %v1541_v8  ;;  %v3375_v41 = vmul.f32 %v1546_v21, %v1542_v32  ;;  %vm1715_vm14 = vcmp.eq.s32.totalorder %v2385_v54, %v3428_v5 }
0x1840   : > { %v1948_v31 = vsub.s32 %v1945_v51, %v3129_v22 }
0x1841   : > { %v1574_v13 = vrot.slane %v3373_v11, 4  ;;  %v1580_v14 = vrot.slane %v3375_v41, 4  ;;  %v3382_v36 = vmul.f32 %v2379_v26, %v3375_v41  ;;  %v3385_v37 = vmul.f32 %v2378_v9, %v3373_v11 }
0x1842   : > { %v3389_v15 = vmul.f32 %v3373_v11, %v3250_v18  ;;  %v3393_v29 = vmul.f32 %v3375_v41, %v3252_v49  ;;  %v3476_v25 = vmul.f32 %v3375_v41, %v3260_v34 }
0x1843   : > { %v1575_v30 = vadd.f32 %v1574_v13, %v3373_v11  ;;  %v1581_v33 = vadd.f32 %v1580_v14, %v3375_v41  ;;  %v1696_v16 = vrot.slane %v3382_v36, 4  ;;  %v1690_v50 = vrot.slane %v3385_v37, 4 }
0x1844   : > { %v2415_v7 = vtrunc.f32 %v3382_v36  ;;  %v2413_v19 = vtrunc.f32 %v3385_v37  ;;  %v1912_v18 = vmax.f32 %v3389_v15, %v3393_v29 }
0x1845   : > { %v1576_v20 = vrot.slane %v1575_v30, 2  ;;  %v1582_v17 = vrot.slane %v1581_v33, 2  ;;  %v1697_v49 = vadd.f32 %v1696_v16, %v3382_v36  ;;  %v1691_v12 = vadd.f32 %v1690_v50, %v3385_v37 }
0x1846   : > { %v2416_v24 = vcvt.f32.s32 %v2415_v7  ;;  %v2414_v35 = vcvt.f32.s32 %v2413_v19  ;;  %v679_v7 = vld [vmem:[%s660_s14] sm:$0xff] }
0x1847   : > { %v1577_v39 = vadd.f32 %v1576_v20, %v1575_v30  ;;  %v1583_v40 = vadd.f32 %v1582_v17, %v1581_v33  ;;  %v1698_v42 = vrot.slane %v1697_v49, 2  ;;  %v1692_v43 = vrot.slane %v1691_v12, 2 }
0x1848   : > { %v1573_v48 = vmul.u32 %v2416_v24, %v3129_v22  ;;  %v1572_v45 = vmul.u32 %v2414_v35, %v3129_v22  ;;  %v2386_v30 = vsel %vm1714_vm9, 1.0, %v2810_v1  ;;  %v3472_v35 = vmul.f32 %v3373_v11, %v3258_v27 }
0x1849   : > { %v1578_v55 = vrot.slane %v1577_v39, 1  ;;  %v1584_v44 = vrot.slane %v1583_v40, 1  ;;  %v1699_v46 = vadd.f32 %v1698_v42, %v1697_v49  ;;  %v1693_v56 = vadd.f32 %v1692_v43, %v1691_v12 }
0x184a   : > { %v1595_v47 = vrot.slane %v1573_v48, 4  ;;  %v1586_v57 = vrot.slane %v1572_v45, 4  ;;  %1963 = vst [vmem:[%s3408_s17] sm:$0xff] %v1572_v45  ;;  %1964 = vst [vmem:[%s3408_s17 + $0x8] sm:$0xff] %v1573_v48  ;;  %v1907_v38 = vmax.f32 %v3472_v35, %v3476_v25 }
0x184b   : > { %v3412_v58 = vadd.f32 %v1578_v55, %v1577_v39  ;;  %v3414_v59 = vadd.f32 %v1584_v44, %v1583_v40  ;;  %v1700_v52 = vrot.slane %v1699_v46, 1  ;;  %v1694_v60 = vrot.slane %v1693_v56, 1 }
0x184c   : > { %vm1596_vm4 = vcmp.gt.s32.totalorder %v1573_v48, %v1595_v47  ;;  %vm1587_vm5 = vcmp.gt.s32.totalorder %v1572_v45, %v1586_v57 }
0x184d   : > { %v1701_v53 = vadd.f32 %v1700_v52, %v1699_v46  ;;  %v1695_v61 = vadd.f32 %v1694_v60, %v1693_v56  ;;  %v1597_v62 = vsel %vm1596_vm4, %v1573_v48, %v1595_v47  ;;  %v1588_v63 = vsel %vm1587_vm5, %v1572_v45, %v1586_v57 }
0x184e   : > { %v1598_v0 = vrot.slane %v1597_v62, 2  ;;  %v1589_v2 = vrot.slane %v1588_v63, 2  ;;  %v1942_v4 = vcombine.low %v3412_v58, %v3414_v59 }
0x184f   : > { %v1704_v28 = vsub.f32 8.0, %v1701_v53  ;;  %v1703_v3 = vsub.f32 8.0, %v1695_v61 }
0x1850   : > { %vm1599_vm8 = vcmp.gt.s32.totalorder %v1597_v62, %v1598_v0  ;;  %vm1590_vm10 = vcmp.gt.s32.totalorder %v1588_v63, %v1589_v2  ;;  %v1949_v13 = vrot.slane %v1942_v4, %v1948_v31 }
0x1851   : > { %v1706_v6 = vadd.f32 %v1704_v28, %v3382_v36  ;;  %v1705_v21 = vadd.f32 %v1703_v3, %v3385_v37  ;;  %v1600_v8 = vsel %vm1599_vm8, %v1597_v62, %v1598_v0  ;;  %v1591_v32 = vsel %vm1590_vm10, %v1588_v63, %v1589_v2 }
0x1852   : > { %v1601_v26 = vrot.slane %v1600_v8, 1  ;;  %v1592_v9 = vrot.slane %v1591_v32, 1  ;;  %v1956_v33 = vrot.slane %v1949_v13, %v1948_v31 }
0x1853   : > { %v1708_v10 = vsel %vm1702_vm6, %v1706_v6, %v3382_v36  ;;  %v1707_v14 = vsel %vm1702_vm6, %v1705_v21, %v3385_v37  ;;  %v2817_v36 = vmov 1.0   ;;  %v2387_v37 = vsel %vm1715_vm14, 1.0, %v2810_v1 }
0x1854   : > { %1756 = vmatprep.subr.mxu1 %v1708_v10  ;;  %vm1602_vm12 = vcmp.gt.s32.totalorder %v1600_v8, %v1601_v26  ;;  %vm1593_vm13 = vcmp.gt.s32.totalorder %v1591_v32, %v1592_v9  ;;  %1962 = vst.msk [vmem:[%s3445_s3] sm:$0x3] %vm3422_vm7, %v1956_v33 }
0x1855   : > { %1757 = vmatpush1.msra.mxu1 %v1707_v14  ;;  %v1603_v16 = vsel %vm1602_vm12, %v1600_v8, %v1601_v26  ;;  %v1594_v50 = vsel %vm1593_vm13, %v1591_v32, %v1592_v9 }
0x1856   : > { %vm1605_vm15 = vcmp.eq.s32.totalorder %v3129_v22, %v1603_v16  ;;  %2388 = vmatmul.mubr.msk.f32.vlgmr.msra.gmra.mxu1 %vm1610_vm11, %v2386_v30  ;;  %vm1604_vm0 = vcmp.eq.s32.totalorder %v3129_v22, %v1594_v50 }
0x1857   : > { %2382 = vmatprep.subr.msk.mxu0 %vm1605_vm15, %v2817_v36  ;;  %1796 = vmatprep.mubr.f32.mxu1 %v2810_v1 }
0x1858   : > { %2383 = vmatpush1.msk.msra.mxu0 %vm1604_vm0, %v2817_v36 }
0x1859   : > { %2384 = vmatmul.mubr.msk.f32.vlgmr.msra.gmra.mxu0 %vm1610_vm11, %v679_v7 }
0x185a   : > { %2389 = vmatmul.mubr.msk.f32.gmra.mxu1 %vm1610_vm11, %v2387_v37 }
0x1916   : > { %v3458_v19 = vpop.f32.mrf.mxu1 }
0x1918   : > { %v3460_v20 = vpop.f32.mrf.mxu1 }
0x1919   : > { %v1803_v17 = vadd.f32 %v3460_v20, %v3458_v19  ;;  %v1680_v39 = vpop.f32.mrf.mxu0 }
0x191a   : > { %v3464_v49 = vpop.f32.mrf.mxu1 }
0x191b   : > { %1804 = vadd.xlane.f32.xlu1 %v1803_v17  ;;  %v1682_v40 = vpop.f32.mrf.mxu0 }
0x191c   : > { %v3466_v12 = vpop.f32.mrf.mxu1  ;;  %v1687_v42 = vcombine.low %v1680_v39, %v1682_v40 }
0x191d   : > { %v1806_v24 = vadd.f32 %v3466_v12, %v3464_v49 }
0x191e   : > { %1689 = vst [vmem:[%s622_s21] sm:$0xff] %v1687_v42 }
0x191f   : > { %1807 = vadd.xlane.f32.xlu1 %v1806_v24 }
0x1923   : > { %1908 = vmax.xlane.f32.xlu1 %v1907_v38 }
0x1927   : > { %1913 = vmax.xlane.f32.xlu1 %v1912_v18 }
0x1928   : > { %2658 = shalt.err (!%p2655_p1)
}
0x1929   : > { %s2659_s19 = scalar_lea.hbm %s1993_s22, 128  ;;  %s2663_s21 = scalar_lea.hbm %s3696_s23, 256 }
0x192a   : > { %p2660_p10 = scmp.ne.s32.totalorder %s1993_s22, %s2659_s19  ;;  %p2664_p3 = scmp.lt.s32.totalorder %s1993_s22, %s3696_s23 }
0x192b   : > { %p2665_p12 = scmp.lt.s32.totalorder %s2663_s21, %s2659_s19 }
0x192c   : > { %p2661_p6 = pnand %p2660_p10, %p3697_p11 }
0x192d   : > { %p2666_p13 = por %p2665_p12, %p2664_p3 }
0x192e   : > { %p2662_p0 = pneg %p2661_p6 }
0x1930   : > { %p2667_p8 = pnand %p2666_p13, %p2662_p0 }
0x1932   : > { %2670 = shalt.err (!%p2667_p8)
}
0x1933   : > { %2427 = dma.vmem_to_hbm [thread:$0]  (%p3697_p11), %s1996_s13, 128, %s1993_s22, %s1966_s29  }
0x1934   : > { %s2412_s10 = sshll.u32 %s2990_s1, 8  ;;  %s2039_s16 = sshll.u32 %s3408_s17, 4  ;;  %s2040_s16 = int_to_ptr.vmem [resolvable:$true] %s2039_s16 }
0x1935   : > { %s3698_s28 = sld [smem:[#allocation31_spill]]  ;;  %s1981_s12 = scalar_lea.sflag [#allocation14], %s3072_s30 }
0x1936   : > { %s2671_s11 = scalar_lea.vmem %s2040_s16, 256  ;;  %s2819_s19 = smov [#allocation13]  }
0x1937   : > { %p2672_p5 = scmp.ne.s32.totalorder %s2040_s16, %s2671_s11  ;;  %s2675_s21 = sshll.u32 %s2819_s19, 4  ;;  %s2676_s21 = int_to_ptr.vmem [resolvable:$false] %s2675_s21 }
0x1938   : > { %s2677_s15 = scalar_lea.vmem %s2676_s21, 512  ;;  %p2678_p4 = scmp.lt.s32.totalorder %s2040_s16, %s2676_s21 }
0x1939   : > { %p2673_p7 = pnand %p2672_p5, %p3697_p11  ;;  %p2679_p9 = scmp.lt.s32.totalorder %s2677_s15, %s2671_s11 }
0x193b   : > { %s3699_s7 = smov %s3698_s28  ;;  %s2037_s14 = scalar_lea.hbm %s3698_s28, %s2412_s10 }
0x193c   : > { %p2674_p2 = pneg %p2673_p7  ;;  %p2680_p1 = por %p2679_p9, %p2678_p4 }
0x193e   : > { %p2681_p10 = pnand %p2680_p1, %p2674_p2 }
0x1940   : > { %2684 = shalt.err (!%p2681_p10)
}
0x1941   : > { %s2685_s17 = scalar_lea.hbm %s2037_s14, 256  ;;  %s2689_s29 = scalar_lea.hbm %s3699_s7, 512 }
0x1942   : > { %p2686_p6 = scmp.ne.s32.totalorder %s2037_s14, %s2685_s17  ;;  %p2690_p12 = scmp.lt.s32.totalorder %s2037_s14, %s3699_s7 }
0x1943   : > { %p2691_p13 = scmp.lt.s32.totalorder %s2689_s29, %s2685_s17 }
0x1944   : > { %p2687_p0 = pnand %p2686_p6, %p3697_p11 }
0x1945   : > { %p2692_p8 = por %p2691_p13, %p2690_p12 }
0x1946   : > { %p2688_p3 = pneg %p2687_p0 }
0x1948   : > { %p2693_p5 = pnand %p2692_p8, %p2688_p3 }
0x194a   : > { %2696 = shalt.err (!%p2693_p5)
}
0x194b   : > { %2430 = dma.vmem_to_hbm [thread:$0]  (%p3697_p11), %s2040_s16, 256, %s2037_s14, %s1981_s12  }
0x194c   : > { %s2337_s15 = sshll.u32 %s3072_s30, 5  ;;  %s2410_s30 = sshll.u32 %s2990_s1, 9 }
0x194d   : > { %s629_s16 = scalar_lea.vmem [#allocation10], %s2337_s15  ;;  %s2411_s28 = sshll.u32 %s2990_s1, 5 }
0x194e   : > { %s2008_s27 = sshll.u32 %s629_s16, 4  ;;  %s2025_s14 = sshll.u32 %s3445_s3, 4  ;;  %s3561_s27 = int_to_ptr.vmem [resolvable:$true] %s2008_s27  ;;  %s3568_s14 = int_to_ptr.vmem [resolvable:$true] %s2025_s14 }
0x194f   : > { %s3700_s19 = sld [smem:[#allocation29_spill]]  ;;  %s3702_s29 = sand.u32 1, %s2990_s1  }
0x1950   : > { %s3701_s22 = sld [smem:[#allocation30_spill]]  ;;  %s3572_s10 = scalar_lea.sflag [#allocation11], %s3702_s29 }
0x1951   : > { %s2697_s24 = scalar_lea.vmem %s3561_s27, 512  ;;  %s2820_s15 = smov [#allocation10]  }
0x1952   : > { %p2698_p7 = scmp.ne.s32.totalorder %s3561_s27, %s2697_s24 }
0x1954   : > { %p2699_p2 = pnand %p2698_p7, %p3697_p11 }
0x1955   : > { %s3559_s21 = scalar_lea.hbm %s3700_s19, %s2410_s30  ;;  %s2701_s30 = sshll.u32 %s2820_s15, 4  ;;  %s2702_s30 = int_to_ptr.vmem [resolvable:$false] %s2701_s30 }
0x1956   : > { %s3566_s13 = scalar_lea.hbm %s3701_s22, %s2411_s28  ;;  %p2700_p4 = pneg %p2699_p2 }
0x1957   : > { %s2703_s12 = scalar_lea.vmem %s2702_s30, 1024  ;;  %p2704_p9 = scmp.lt.s32.totalorder %s3561_s27, %s2702_s30 }
0x1958   : > { %p2705_p1 = scmp.lt.s32.totalorder %s2703_s12, %s2697_s24 }
0x195a   : > { %p2706_p10 = por %p2705_p1, %p2704_p9 }
0x195c   : > { %p2707_p6 = pnand %p2706_p10, %p2700_p4 }
0x19a4   : > { %v1805_v27 = vpop.xlane.xlu1 %1804 }
0x19a8   : > { %v1808_v34 = vpop.xlane.xlu1 %1807 }
0x19a9   : > { %v1809_v11 = vmax.f32 %v1805_v27, %v1808_v34 }
0x19ab   : > { %v1810_v41 = vrot.slane %v1809_v11, 4 }
0x19ac   : > { %v1909_v52 = vpop.xlane.xlu1 %1908 }
0x19ad   : > { %v1811_v15 = vmax.f32 %v1809_v11, %v1810_v41  ;;  %v1915_v53 = vadd.f32 1e-09, %v1909_v52  ;;  %v1860_v11 = vsub.f32 8.0, %v3414_v59 }
0x19af   : > { %v1812_v29 = vrot.slane %v1811_v15, 2  ;;  %2529 = vrcp.f32 %v1915_v53 }
0x19b0   : > { %v1914_v30 = vpop.xlane.xlu1 %1913 }
0x19b1   : > { %v1813_v18 = vmax.f32 %v1811_v15, %v1812_v29 }
0x19b3   : > { %v1814_v43 = vrot.slane %v1813_v18, 1 }
0x19b5   : > { %v1815_v48 = vmax.f32 %v1813_v18, %v1814_v43 }
0x19b7   : > { %vm1816_vm1 = vcmp.eq.f32.partialorder %v1805_v27, %v1815_v48  ;;  %vm1817_vm2 = vcmp.eq.f32.partialorder %v1808_v34, %v1815_v48  ;;  %v1859_v34 = vsub.f32 8.0, %v3412_v58 }
0x19b8   : > { %v1818_v45 = vsel %vm1816_vm1, %v3129_v22, 16  ;;  %v1819_v55 = vsel %vm1817_vm2, %v3428_v5, 16 }
0x19b9   : > { %vm1820_vm3 = vcmp.lt.s32.totalorder %v1818_v45, %v1819_v55 }
0x19ba   : > { %v1821_v44 = vsel %vm1820_vm3, %v1818_v45, %v1819_v55 }
0x19bb   : > { %v1822_v46 = vrot.slane %v1821_v44, 4 }
0x19bc   : > { %v2530_v26 = vpop.eup %2529 }
0x19bd   : > { %vm1823_vm4 = vcmp.lt.s32.totalorder %v1821_v44, %v1822_v46  ;;  %v1917_v33 = vmul.f32 %v2530_v26, %v1914_v30 }
0x19be   : > { %v1824_v56 = vsel %vm1823_vm4, %v1821_v44, %v1822_v46 }
0x19bf   : > { %v1825_v47 = vrot.slane %v1824_v56, 2  ;;  %v1918_v7 = vmul.f32 %v1917_v33, %v3472_v35  ;;  %v1919_v17 = vmul.f32 %v1917_v33, %v3476_v25 }
0x19c1   : > { %vm1826_vm5 = vcmp.lt.s32.totalorder %v1824_v56, %v1825_v47  ;;  %v1920_v24 = vrot.slane %v1918_v7, 4  ;;  %v1926_v38 = vrot.slane %v1919_v17, 4 }
0x19c2   : > { %v1827_v57 = vsel %vm1826_vm5, %v1824_v56, %v1825_v47 }
0x19c3   : > { %v1828_v51 = vrot.slane %v1827_v57, 1  ;;  %v1921_v39 = vmax.f32 %v1918_v7, %v1920_v24  ;;  %v1927_v42 = vmax.f32 %v1919_v17, %v1926_v38 }
0x19c5   : > { %vm1829_vm6 = vcmp.lt.s32.totalorder %v1827_v57, %v1828_v51  ;;  %v1922_v41 = vrot.slane %v1921_v39, 2  ;;  %v1928_v29 = vrot.slane %v1927_v42, 2 }
0x19c6   : > { %v1830_v60 = vsel %vm1829_vm6, %v1827_v57, %v1828_v51 }
0x19c7   : > { %vm1831_vm7 = vcmp.eq.s32.totalorder %v3129_v22, %v1830_v60  ;;  %vm1832_vm8 = vcmp.eq.s32.totalorder %v3428_v5, %v1830_v60  ;;  %v1923_v45 = vmax.f32 %v1921_v39, %v1922_v41  ;;  %v1929_v44 = vmax.f32 %v1927_v42, %v1928_v29 }
0x19c8   : > { %v3525_v61 = vsel %vm1831_vm7, 1.0, %v2810_v1  ;;  %v3528_v62 = vsel %vm1832_vm8, 1.0, %v2810_v1 }
0x19c9   : > { %v1837_v54 = vsub.f32 1.0, %v3525_v61  ;;  %v1838_v63 = vsub.f32 1.0, %v3528_v62  ;;  %v1924_v57 = vrot.slane %v1923_v45, 1  ;;  %vm1887_vm13 = vcmp.gt.f32.partialorder %v3525_v61, 0.0 }
0x19ca   : > { %vm1888_vm14 = vcmp.gt.f32.partialorder %v3528_v62, 0.0 }
0x19cb   : > { %v1839_v0 = vmul.f32 %v1837_v54, %v3458_v19  ;;  %v1840_v2 = vmul.f32 %v1837_v54, %v3460_v20  ;;  %v1841_v31 = vmul.f32 %v1838_v63, %v3464_v49  ;;  %v1842_v22 = vmul.f32 %v1838_v63, %v3466_v12 }
0x19cd   : > { %v1843_v28 = vadd.f32 %v1841_v31, %v1839_v0  ;;  %v1850_v3 = vadd.f32 %v1842_v22, %v1840_v2  ;;  %v1925_v0 = vmax.f32 %v1923_v45, %v1924_v57 }
0x19cf   : > { %v1844_v4 = vrot.slane %v1843_v28, 4  ;;  %v1851_v23 = vrot.slane %v1850_v3, 4 }
0x19d1   : > { %v1845_v5 = vadd.f32 %v1844_v4, %v1843_v28  ;;  %v1852_v1 = vadd.f32 %v1851_v23, %v1850_v3 }
0x19d3   : > { %v1846_v6 = vrot.slane %v1845_v5, 2  ;;  %v1853_v21 = vrot.slane %v1852_v1, 2 }
0x19d5   : > { %v1847_v8 = vadd.f32 %v1846_v6, %v1845_v5  ;;  %v1854_v32 = vadd.f32 %v1853_v21, %v1852_v1 }
0x19d7   : > { %v1848_v9 = vrot.slane %v1847_v8, 1  ;;  %v1855_v13 = vrot.slane %v1854_v32, 1 }
0x19d9   : > { %v1849_v10 = vadd.f32 %v1848_v9, %v1847_v8  ;;  %v1856_v14 = vadd.f32 %v1855_v13, %v1854_v32 }
0x19db   : > { %v1863_v16 = vsub.f32 %v3412_v58, %v1849_v10  ;;  %v1864_v50 = vsub.f32 %v3414_v59, %v1856_v14  ;;  %v1857_v40 = vsub.f32 8.0, %v1849_v10  ;;  %v1858_v27 = vsub.f32 8.0, %v1856_v14 }
0x19dc   : > { %v1930_v59 = vrot.slane %v1929_v44, 1 }
0x19dd   : > { %vm1865_vm9 = vcmp.ne.f32.partialorder %v1863_v16, 0.0  ;;  %vm1866_vm10 = vcmp.ne.f32.partialorder %v1864_v50, 0.0  ;;  %v1861_v15 = vsub.f32 %v1857_v40, %v1859_v34  ;;  %v1862_v35 = vsub.f32 %v1858_v27, %v1860_v11 }
0x19de   : > { %v1867_v36 = vsel %vm1865_vm9, %v1863_v16, 1.0  ;;  %v1868_v37 = vsel %vm1866_vm10, %v1864_v50, 1.0  ;;  %v1931_v28 = vmax.f32 %v1929_v44, %v1930_v59 }
0x19df   : > { %2531 = vrcp.f32 %v1867_v36 }
0x19e0   : > { %2533 = vrcp.f32 %v1868_v37 }
0x19ec   : > { %v2532_v18 = vpop.eup %2531 }
0x19ed   : > { %v2534_v43 = vpop.eup %2533  ;;  %v1870_v48 = vmul.f32 %v2532_v18, %v1861_v15 }
0x19ee   : > { %v1872_v25 = vmul.f32 %v2534_v43, %v1862_v35 }
0x19ef   : > { %v1877_v55 = vsub.f32 0.0, %v1870_v48  ;;  %v1875_v51 = vfloor.f32 %v1870_v48  ;;  %vm1873_vm11 = vcmp.ge.f32.partialorder %v1870_v48, 0.0 }
0x19f0   : > { %v1878_v46 = vsub.f32 0.0, %v1872_v25  ;;  %v1876_v52 = vfloor.f32 %v1872_v25  ;;  %vm1874_vm12 = vcmp.ge.f32.partialorder %v1872_v25, 0.0 }
0x19f1   : > { %v1879_v56 = vfloor.f32 %v1877_v55 }
0x19f2   : > { %v1880_v47 = vfloor.f32 %v1878_v46 }
0x19f3   : > { %v1881_v58 = vsub.f32 0.0, %v1879_v56 }
0x19f4   : > { %v1882_v60 = vsub.f32 0.0, %v1880_v47 }
0x19f5   : > { %v1883_v53 = vsel %vm1873_vm11, %v1875_v51, %v1881_v58 }
0x19f6   : > { %v1884_v54 = vsel %vm1874_vm12, %v1876_v52, %v1882_v60  ;;  %v1885_v63 = vsel %vm1865_vm9, %v1883_v53, %v1861_v15 }
0x19f7   : > { %v1886_v2 = vsel %vm1866_vm10, %v1884_v54, %v1862_v35  ;;  %v1893_v31 = vsel %vm1887_vm13, %v1885_v63, %v3458_v19  ;;  %v1895_v22 = vsel %vm1888_vm14, %v1885_v63, %v3464_v49 }
0x19f8   : > { %v1894_v61 = vsel %vm1887_vm13, %v1886_v2, %v3460_v20  ;;  %v1896_v3 = vsel %vm1888_vm14, %v1886_v2, %v3466_v12  ;;  %vm1897_vm15 = vcmp.gt.f32.partialorder %v1893_v31, 1.0  ;;  %vm1899_vm0 = vcmp.gt.f32.partialorder %v1895_v22, 1.0 }
0x19f9   : > { %vm1898_vm1 = vcmp.gt.f32.partialorder %v1894_v61, 1.0  ;;  %vm1900_vm2 = vcmp.gt.f32.partialorder %v1896_v3, 1.0  ;;  %v1901_v62 = vsel %vm1897_vm15, 1.0, %v1893_v31  ;;  %v1903_v4 = vsel %vm1899_vm0, 1.0, %v1895_v22 }
0x19fa   : > { %v1902_v19 = vsel %vm1898_vm1, 1.0, %v1894_v61  ;;  %v1904_v23 = vsel %vm1900_vm2, 1.0, %v1896_v3  ;;  %v1932_v49 = vmul.f32 %v1925_v0, %v1901_v62  ;;  %v1934_v5 = vmul.f32 %v1925_v0, %v1903_v4 }
0x19fb   : > { %v1933_v20 = vmul.f32 %v1931_v28, %v1902_v19  ;;  %v1935_v12 = vmul.f32 %v1931_v28, %v1904_v23 }
0x19fc   : > { %1936 = vst [vmem:[%s629_s16] sm:$0xff] %v1932_v49  ;;  %1938 = vst [vmem:[%s629_s16 + $0x10] sm:$0xff] %v1934_v5 }
0x19fd   : > { %1937 = vst [vmem:[%s629_s16 + $0x8] sm:$0xff] %v1933_v20  ;;  %1939 = vst [vmem:[%s629_s16 + $0x18] sm:$0xff] %v1935_v12 }
0x19fe   : > { %2710 = shalt.err (!%p2707_p6)
}
0x19ff   : > { %s2711_s1 = scalar_lea.hbm %s3559_s21, 512  ;;  %s2715_s11 = scalar_lea.hbm %s3700_s19, 1024 }
0x1a00   : > { %p2712_p0 = scmp.ne.s32.totalorder %s3559_s21, %s2711_s1  ;;  %p2716_p13 = scmp.lt.s32.totalorder %s3559_s21, %s3700_s19 }
0x1a01   : > { %p2717_p8 = scmp.lt.s32.totalorder %s2715_s11, %s2711_s1 }
0x1a02   : > { %p2713_p3 = pnand %p2712_p0, %p3697_p11 }
0x1a03   : > { %p2718_p5 = por %p2717_p8, %p2716_p13 }
0x1a04   : > { %p2714_p12 = pneg %p2713_p3 }
0x1a06   : > { %p2719_p7 = pnand %p2718_p5, %p2714_p12 }
0x1a08   : > { %2722 = shalt.err (!%p2719_p7)
}
0x1a09   : > { %s2821_s29 = smov 256   ;;  %s2822_s24 = smov 16  }
0x1a0a   : > { %2428 = dma.vmem_to_hbm [thread:$0]  (%p3697_p11), %s3561_s27, 512, %s3559_s21, %s3572_s10, %s2821_s29, %s2821_s29, %s2822_s24  }
0x1a0b   : > { %s2723_s15 = scalar_lea.vmem %s3568_s14, 32  ;;  %s2823_s30 = smov [#allocation12]  }
0x1a0c   : > { %p2724_p2 = scmp.ne.s32.totalorder %s3568_s14, %s2723_s15  ;;  %s2727_s12 = sshll.u32 %s2823_s30, 4  ;;  %s2728_s12 = int_to_ptr.vmem [resolvable:$false] %s2727_s12 }
0x1a0d   : > { %s2729_s1 = scalar_lea.vmem %s2728_s12, 64  ;;  %p2730_p1 = scmp.lt.s32.totalorder %s3568_s14, %s2728_s12 }
0x1a0e   : > { %p2725_p4 = pnand %p2724_p2, %p3697_p11  ;;  %p2731_p10 = scmp.lt.s32.totalorder %s2729_s1, %s2723_s15 }
0x1a10   : > { %p2726_p9 = pneg %p2725_p4  ;;  %p2732_p6 = por %p2731_p10, %p2730_p1 }
0x1a12   : > { %p2733_p0 = pnand %p2732_p6, %p2726_p9 }
0x1a14   : > { %2736 = shalt.err (!%p2733_p0)
}
0x1a15   : > { %s2737_s16 = scalar_lea.hbm %s3566_s13, 32  ;;  %s2741_s28 = scalar_lea.hbm %s3701_s22, 64 }
0x1a16   : > { %p2738_p3 = scmp.ne.s32.totalorder %s3566_s13, %s2737_s16  ;;  %p2742_p8 = scmp.lt.s32.totalorder %s3566_s13, %s3701_s22 }
0x1a17   : > { %p2743_p5 = scmp.lt.s32.totalorder %s2741_s28, %s2737_s16 }
0x1a18   : > { %p2739_p12 = pnand %p2738_p3, %p3697_p11 }
0x1a19   : > { %p2744_p7 = por %p2743_p5, %p2742_p8 }
0x1a1a   : > { %p2740_p13 = pneg %p2739_p12 }
0x1a1c   : > { %p2745_p2 = pnand %p2744_p7, %p2740_p13 }
0x1a1e   : > { %2748 = shalt.err (!%p2745_p2)
}
0x1a1f   : > { %2429 = dma.vmem_to_hbm [thread:$0]  (%p3697_p11), %s3568_s14, 32, %s3566_s13, %s3572_s10  }
0x1a20 PF: > { %s3703_s17 = sld [smem:[#allocation22_spill]]  ;;  %s2051_s29 = sand.u32 1, %s2791_s25  }
0x1a21   : > { %p3704_p4 = scmp.ne.s32.totalorder %s3685_s20, 0  ;;  %s2052_s24 = scalar_lea.sflag [#allocation4], %s2051_s29 }
0x1a26   : > { %p3705_p9 = scmp.ge.s32.totalorder %s3703_s17, 2 }
0x1a28   : > { %p2450_p1 = pnand %p3705_p9, %p3704_p4 }
0x1a2a   : > { %p2451_p10 = pneg %p2450_p1 }
0x1a2c   : > { %2778 = dma.done.wait (%p2451_p10), %s2052_s24, 128  }
0x1a2d   : > { %2780 = vsyncadd (%p2451_p10), %s2052_s24, 4294967168  ;;  %s3706_s15 = sadd.s32 4294967294, %s3703_s17  }
0x1a2e   : > { %s2060_s30 = sand.u32 1, %s3706_s15  }
0x1a2f   : > { %s2061_s18 = scalar_lea.sflag [#allocation11], %s2060_s30 }
0x1a30   : > { %2782 = dma.done.wait (%p2451_p10), %s2061_s18, 544  }
0x1a31   : > { %2784 = vsyncadd (%p2451_p10), %s2061_s18, 4294966752  ;;  %s2079_s12 = scalar_lea.sflag [#allocation14], %s2051_s29 }
0x1a32   : > { %2786 = dma.done.wait (%p2451_p10), %s2079_s12, 256  }
0x1a33   : > { %2788 = vsyncadd (%p2451_p10), %s2079_s12, 4294967040  ;;  %s3707_s28 = sld [smem:[#allocation23_spill]]  ;;  %s3710_s25 = smov %s2795_s26 }
0x1a34   : > { %s3708_s14 = sld [smem:[#allocation21_spill]] }
0x1a35   : > { %s3709_s27 = sld [smem:[#allocation24_spill]] }
0x1a39   : > { %p34_p11 = scmp.ge.s32.totalorder %s3707_s28, 4  }
0x1a3a   : > { %s3711_s26 = smov %s3708_s14 }
0x1a3b   :  { %36 = sbr.rel (!%p34_p11) target bundleno = 18 (0x12), region = 198 }
0x1a40   :  { %2084 = vsyncpa [#allocation3], 1 }
0x1a41   :  { %2086 = vsyncpa [#allocation3 + $0x1], 1 }
0x1a42   :  { %2087 = vsyncpa [#allocation6], 1 }
0x1a43   :  { %2088 = vsyncpa [#allocation4], 1 }
0x1a44   :  { %2090 = vsyncpa [#allocation4 + $0x1], 1 }
0x1a45   :  { %2091 = vsyncpa [#allocation11], 1 }
0x1a46   :  { %2093 = vsyncpa [#allocation11 + $0x1], 1 }
0x1a47   :  { %2094 = vsyncpa [#allocation14], 1 }
0x1a48   :  { %2096 = vsyncpa [#allocation14 + $0x1], 1 }

</bundles_post_ra>
